<compile_context>
chip_gen: v5e
topology: v5e:2x2
jax: 0.10.0
libtpu: 0.0.40
codegen_flags: <defaults>
</compile_context>

<pallas_src>
import functools

import numpy as np

import jax
import jax.numpy as jnp
from jax import lax
from jax.experimental import pallas as pl
from jax.experimental.pallas import tpu as pltpu


_LANE_PAD = 128   # leading/trailing zero pad of the flattened staging buffers
                  # (multiple of 128 keeps data-region writes lane-aligned,
                  #  must be >= W + 1 for the 3x3 halo of the first/last row)


def _round_up(x, m):
    return ((x + m - 1) // m) * m


# ----------------------------------------------------------------------------
# Fully fused kernel:
#   upsample(x1) ++ x2  ->  conv3x3+BN+ReLU  ->  conv3x3+BN+ReLU
# Layout inside the kernel: (channels, columns) with all NB images of the batch
# block stacked along the flattened-spatial lane axis, separated by zero gaps.
# ----------------------------------------------------------------------------
def _up_fused_kernel(x1_ref, x2_ref, masks_ref, up_mat_ref,
                     w1_ref, t1_ref, w2_ref, t2_ref,
                     o_ref,
                     comb_buf, mid_buf,
                     *, W, HW, NB, C1, C2, Cmid, STRIDE, TOTW):
    P = _LANE_PAD

    mask_l = masks_ref[0:1, :]    # (1, TOTW): 0 where x == 0     (kx = -1 taps)
    mask_r = masks_ref[1:2, :]    # (1, TOTW): 0 where x == W-1   (kx = +1 taps)
    valid  = masks_ref[2:3, :]    # (1, TOTW): 0 on inter-image gap columns

    # Zero the staging buffers EVERY grid step (not just program_id == 0):
    # correct under v7x dual-TensorCore 'parallel' sharding of the batch axis
    # and keeps the halo / inter-image gap / padded-channel regions zero.
    comb_buf[...] = jnp.zeros(comb_buf.shape, comb_buf.dtype)
    mid_buf[...] = jnp.zeros(mid_buf.shape, mid_buf.dtype)

    def im2col(buf):
        # buf: (Cpad, P + TOTW + P) zero-padded flattened image stack (bf16).
        # 9 static lane-offset slices; horizontal wrap suppressed with the
        # precomputed edge masks; stacked once into a (9*Cpad, TOTW) bf16 block
        # that feeds a single MXU matmul for the whole batch block.
        pieces = []
        for ky in (-1, 0, 1):
            for kx in (-1, 0, 1):
                start = P + ky * W + kx            # static; >= 0 since P > W
                s = buf[:, start:start + TOTW]
                if kx == -1:
                    s = s * mask_l
                elif kx == 1:
                    s = s * mask_r
                pieces.append(s)
        return jnp.concatenate(pieces, axis=0)

    # ---- fused concat: stage skip channels and the bilinearly upsampled
    #      (+ zero padded) x1 into ONE combined halo-padded flat buffer. ----
    for b in range(NB):                            # static unroll
        s_b = P + b * STRIDE                       # multiple of 128 -> aligned
        comb_buf[0:C2, s_b:s_b + HW] = x2_ref[b]
        # align_corners bilinear x2 upsample + zero pad to the skip size,
        # expressed as one bf16 matmul with the precomputed interp matrix.
        up_b = jnp.dot(x1_ref[b], up_mat_ref[...],
                       preferred_element_type=jnp.float32)     # (C1, HW) f32
        comb_buf[C2:C2 + C1, s_b:s_b + HW] = up_b.astype(comb_buf.dtype)

    # ---- conv1 + folded BN + ReLU: ONE K = 9*(C1+C2)pad matmul ----
    h = jnp.dot(w1_ref[...], im2col(comb_buf),
                preferred_element_type=jnp.float32)            # (Cmid, TOTW)
    h = jnp.maximum(h + t1_ref[...], 0.0)
    # Zero the inter-image gap columns (ReLU(bias) there is nonzero) before
    # they serve as conv2's vertical halo; intermediate never leaves VMEM.
    mid_buf[0:Cmid, P:P + TOTW] = (h * valid).astype(mid_buf.dtype)

    # ---- conv2 + folded BN + ReLU ----
    y = jnp.dot(w2_ref[...], im2col(mid_buf),
                preferred_element_type=jnp.float32)            # (Cout, TOTW)
    for b in range(NB):
        c_b = b * STRIDE                                       # aligned slice
        o_ref[b] = jnp.maximum(y[:, c_b:c_b + HW] + t2_ref[...], 0.0)


# ----------------------------------------------------------------------------
# Host-side helpers (one-time parameter / constant preparation)
# ----------------------------------------------------------------------------
def _interp_matrix(n_in, n_out):
    """1-D bilinear interpolation matrix (align_corners=True), shape (n_out, n_in)."""
    m = np.zeros((n_out, n_in), np.float64)
    if n_in == 1 or n_out == 1:
        m[:, 0] = 1.0
        return m
    scale = (n_in - 1) / (n_out - 1)
    for o in range(n_out):
        src = o * scale
        i0 = min(max(int(np.floor(src)), 0), n_in - 1)
        i1 = min(i0 + 1, n_in - 1)
        w = src - i0
        m[o, i0] += 1.0 - w
        m[o, i1] += w
    return m


def _upsample_pad_matrix_T(h_in, w_in, h_out, w_out):
    """M^T (h_in*w_in, h_out*w_out) s.t. flat(up+pad(x)) = flat(x) @ M^T  (bf16)."""
    dy, dx = h_out - 2 * h_in, w_out - 2 * w_in
    # TODO(synk): negative diff (crop) unsupported, matching the original module
    # which would also fail at the concat in that case.
    assert dy >= 0 and dx >= 0, "upsampled x1 larger than skip x2 is unsupported"
    uy = _interp_matrix(h_in, 2 * h_in)
    ux = _interp_matrix(w_in, 2 * w_in)
    uy_p = np.zeros((h_out, h_in), np.float64)
    uy_p[dy // 2: dy // 2 + 2 * h_in, :] = uy
    ux_p = np.zeros((w_out, w_in), np.float64)
    ux_p[dx // 2: dx // 2 + 2 * w_in, :] = ux
    m = np.kron(uy_p, ux_p)                               # (Hout*Wout, Hin*Win)
    return jnp.asarray(m.T).astype(jnp.bfloat16)          # (Hin*Win, Hout*Wout)


def _build_masks(W, HW, stride, totw):
    """(3, totw) bf16: [kx=-1 edge mask, kx=+1 edge mask, inter-image validity]."""
    idx = np.arange(totw)
    x = idx % W
    mask_l = (x > 0).astype(np.float32)
    mask_r = (x < W - 1).astype(np.float32)
    valid = ((idx % stride) < HW).astype(np.float32)
    return jnp.asarray(np.stack([mask_l, mask_r, valid])).astype(jnp.bfloat16)


def _fold_conv_weights(w_hwio, scale, cin_pad):
    """Fold the BN scale into the conv weights and build ONE (Cout, 9*cin_pad)
    bf16 matmul matrix whose column order matches im2col (tap-major, channel-minor)."""
    kh, kw, cin, cout = w_hwio.shape
    w = (w_hwio * scale[None, None, None, :]).reshape(kh * kw, cin, cout)
    w = jnp.transpose(w, (2, 0, 1))                       # (cout, 9, cin)
    w = jnp.pad(w, ((0, 0), (0, 0), (0, cin_pad - cin)))
    return w.reshape(cout, kh * kw * cin_pad).astype(jnp.bfloat16)


def make_conv_params(key, cin, cout, bn_eps=1e-5):
    kw, kb = jax.random.split(key)
    bound = 1.0 / jnp.sqrt(cin * 9.0)
    w = jax.random.uniform(kw, (3, 3, cin, cout), jnp.float32, -bound, bound)
    b = jax.random.uniform(kb, (cout,), jnp.float32, -bound, bound)
    gamma = jnp.ones((cout,), jnp.float32)
    beta = jnp.zeros((cout,), jnp.float32)
    run_mean = jnp.zeros((cout,), jnp.float32)
    run_var = jnp.ones((cout,), jnp.float32)
    scale = gamma / jnp.sqrt(run_var + bn_eps)
    shift = (b - run_mean) * scale + beta
    return w, scale, shift


# ----------------------------------------------------------------------------
# Up.forward (fully fused pallas_call)
# ----------------------------------------------------------------------------
def up_forward(x1, x2, params, *, batch_block=None):
    """x1 (decoder, NCHW), x2 (skip, NCHW) -> NCHW output of the Up block."""
    N, C1, H1, W1 = x1.shape
    N2, C2, H, W = x2.shape
    assert N == N2
    (w1, s1, t1), (w2, s2, t2) = params
    Cmid = w1.shape[-1]
    Cout = w2.shape[-1]
    HW = H * W
    H1W1 = H1 * W1

    # Batch block: by default all images go into one grid step (overhead-bound
    # at small shapes).  Lower it (>= 2 steps) for v7x dual-core / VMEM limits.
    NB = N if batch_block is None else batch_block
    assert N % NB == 0, "batch_block must divide the batch size"
    steps = N // NB

    # Flat-layout halo requirement (see TODO about the 2-D layout for large W).
    assert W + 1 <= _LANE_PAD, "flat staging layout requires W < _LANE_PAD"

    # Inter-image gap: >= one zero row (vertical halo) and a multiple of 128
    # so every per-image column offset stays lane-aligned.
    GAPW = 0 if NB == 1 else int(np.lcm(W, 128))
    STRIDE = HW + GAPW
    TOTW = NB * HW + (NB - 1) * GAPW
    LBUF = _LANE_PAD + TOTW + _LANE_PAD

    CINP = _round_up(C1 + C2, 8)      # merged conv1 input-channel group
    CMP = _round_up(Cmid, 8)

    up_mat = _upsample_pad_matrix_T(H1, W1, H, W)          # (H1W1, HW) bf16
    masks = _build_masks(W, HW, STRIDE, TOTW)              # (3, TOTW) bf16

    # conv1 input channels are [x2 (0:C2) | upsampled x1 (C2:C2+C1)]
    w1m = _fold_conv_weights(w1, s1, CINP)                 # (Cmid, 9*CINP) bf16
    w2m = _fold_conv_weights(w2, s2, CMP)                  # (Cout, 9*CMP)  bf16
    t1c = t1.reshape(Cmid, 1).astype(jnp.float32)
    t2c = t2.reshape(Cout, 1).astype(jnp.float32)

    # Only reshapes + bf16 casts on the host; no transposes / pads / gathers.
    x1f = x1.reshape(N, C1, H1W1).astype(jnp.bfloat16)
    x2f = x2.reshape(N, C2, HW).astype(jnp.bfloat16)

    kernel = functools.partial(_up_fused_kernel, W=W, HW=HW, NB=NB,
                               C1=C1, C2=C2, Cmid=Cmid,
                               STRIDE=STRIDE, TOTW=TOTW)

    flops = steps * (NB * 2 * C1 * H1W1 * HW
                     + 2 * Cmid * 9 * CINP * TOTW
                     + 2 * Cout * 9 * CMP * TOTW)
    bytes_accessed = (N * C1 * H1W1 * 2 + N * C2 * HW * 2 + N * Cout * HW * 4
                      + steps * (3 * TOTW * 2 + H1W1 * HW * 2
                                 + Cmid * 9 * CINP * 2 + Cout * 9 * CMP * 2
                                 + (Cmid + Cout) * 4))

    out = pl.pallas_call(
        kernel,
        out_shape=jax.ShapeDtypeStruct((N, Cout, HW), jnp.float32),
        grid=(steps,),
        in_specs=[
            pl.BlockSpec((NB, C1, H1W1), lambda n: (n, 0, 0)),   # x1 (bf16)
            pl.BlockSpec((NB, C2, HW), lambda n: (n, 0, 0)),     # x2 (bf16)
            pl.BlockSpec((3, TOTW), lambda n: (0, 0)),           # edge/valid masks
            pl.BlockSpec((H1W1, HW), lambda n: (0, 0)),          # upsample matrix
            pl.BlockSpec((Cmid, 9 * CINP), lambda n: (0, 0)),    # conv1 weights
            pl.BlockSpec((Cmid, 1), lambda n: (0, 0)),           # shift1
            pl.BlockSpec((Cout, 9 * CMP), lambda n: (0, 0)),     # conv2 weights
            pl.BlockSpec((Cout, 1), lambda n: (0, 0)),           # shift2
        ],
        out_specs=pl.BlockSpec((NB, Cout, HW), lambda n: (n, 0, 0)),
        scratch_shapes=[
            pltpu.VMEM((CINP, LBUF), jnp.bfloat16),   # merged conv1 input staging
            pltpu.VMEM((CMP, LBUF), jnp.bfloat16),    # conv1 activation staging
        ],
        compiler_params=pltpu.CompilerParams(
            dimension_semantics=("parallel",)),
        cost_estimate=pl.CostEstimate(flops=int(flops), transcendentals=0,
                                      bytes_accessed=int(bytes_accessed)),
    )(x1f, x2f, masks, up_mat, w1m, t1c, w2m, t2c)
    return out.reshape(N, Cout, H, W)


# ----------------------------------------------------------------------------
# Pure-JAX reference (gather-based upsample + XLA convs) for the sanity check
# ----------------------------------------------------------------------------
def upsample2x_bilinear_align_corners(x_nchw):
    N, C, H, W = x_nchw.shape
    Ho, Wo = 2 * H, 2 * W

    def coords(in_size, out_size):
        if in_size == 1 or out_size == 1:
            z = jnp.zeros((out_size,), jnp.int32)
            return jnp.zeros((out_size,), jnp.float32), z, z
        scale = (in_size - 1) / (out_size - 1)
        src = jnp.arange(out_size, dtype=jnp.float32) * scale
        i0 = jnp.clip(jnp.floor(src).astype(jnp.int32), 0, in_size - 1)
        i1 = jnp.clip(i0 + 1, 0, in_size - 1)
        return src - i0.astype(jnp.float32), i0, i1

    wy, y0, y1 = coords(H, Ho)
    wx, x0, x1 = coords(W, Wo)
    rows = (x_nchw[:, :, y0, :] * (1.0 - wy)[None, None, :, None]
            + x_nchw[:, :, y1, :] * wy[None, None, :, None])
    out = (rows[:, :, :, x0] * (1.0 - wx)[None, None, None, :]
           + rows[:, :, :, x1] * wx[None, None, None, :])
    return out


def _ref_forward(x1, x2, params):
    (w1, s1, t1), (w2, s2, t2) = params
    x1u = upsample2x_bilinear_align_corners(x1)
    diffY = x2.shape[2] - x1u.shape[2]
    diffX = x2.shape[3] - x1u.shape[3]
    if diffY > 0 or diffX > 0:
        x1u = jnp.pad(x1u, ((0, 0), (0, 0),
                            (diffY // 2, diffY - diffY // 2),
                            (diffX // 2, diffX - diffX // 2)))
    x = jnp.concatenate([x2, x1u], axis=1)
    x = jnp.transpose(x, (0, 2, 3, 1))
    dn = ('NHWC', 'HWIO', 'NHWC')
    h = lax.conv_general_dilated(x, w1, (1, 1), [(1, 1), (1, 1)],
                                 dimension_numbers=dn)
    h = jnp.maximum(h * s1 + t1, 0.0)
    h = lax.conv_general_dilated(h, w2, (1, 1), [(1, 1), (1, 1)],
                                 dimension_numbers=dn)
    h = jnp.maximum(h * s2 + t2, 0.0)
    return jnp.transpose(h, (0, 3, 1, 2))


if __name__ == "__main__":
    key = jax.random.PRNGKey(0)
    k_x1, k_x2, k_c1, k_c2 = jax.random.split(key, 4)

    # x1: decoder feature (to be upsampled), x2: skip connection
    N, C1, H1, W1 = 2, 4, 8, 8
    C2, H2, W2 = 4, 16, 16
    in_channels = C1 + C2          # 8
    out_channels = 4

    x1 = jax.random.normal(k_x1, (N, C1, H1, W1), jnp.float32)
    x2 = jax.random.normal(k_x2, (N, C2, H2, W2), jnp.float32)

    params = (make_conv_params(k_c1, in_channels, out_channels),
              make_conv_params(k_c2, out_channels, out_channels))

    out = jax.block_until_ready(up_forward(x1, x2, params))
    ref = jax.block_until_ready(_ref_forward(x1, x2, params))

    assert out.shape == (N, out_channels, H2, W2)
    # bf16 matmul inputs / weights / upsample matrix with f32 accumulation
    # against a pure-f32 reference -> loosened tolerance.
    assert jnp.allclose(out, ref, atol=5e-2, rtol=5e-2), \
        f"max abs diff {float(jnp.max(jnp.abs(out - ref)))}"

    print("KERNEL_OK")
</pallas_src>

<mosaic_0001>
module attributes {stable_mosaic.version = 11 : i64} {
  func.func @_up_fused_kernel(%arg0: i32, %arg1: memref<2x4x64xbf16, #tpu.memory_space<vmem>>, %arg2: memref<2x4x256xbf16, #tpu.memory_space<vmem>>, %arg3: memref<3x640xbf16, #tpu.memory_space<vmem>>, %arg4: memref<64x256xbf16, #tpu.memory_space<vmem>>, %arg5: memref<4x72xbf16, #tpu.memory_space<vmem>>, %arg6: memref<4x1xf32, #tpu.memory_space<vmem>>, %arg7: memref<4x72xbf16, #tpu.memory_space<vmem>>, %arg8: memref<4x1xf32, #tpu.memory_space<vmem>>, %arg9: memref<2x4x256xf32, #tpu.memory_space<vmem>>, %arg10: memref<8x896xbf16, #tpu.memory_space<vmem>>, %arg11: memref<8x896xbf16, #tpu.memory_space<vmem>>) attributes {dimension_semantics = [#tpu.dimension_semantics<parallel>], iteration_bounds = array<i64: 1>, scalar_prefetch = 0 : i64, scratch_operands = 2 : i64, tpu.core_type = #tpu.core_type<tc>, window_params = [{transform_indices = @transform_0, window_bounds = array<i64: 2, 4, 64>}, {transform_indices = @transform_1, window_bounds = array<i64: 2, 4, 256>}, {pipeline_mode = #tpu.pipeline_mode<synchronous>, transform_indices = @transform_2, window_bounds = array<i64: 3, 640>}, {pipeline_mode = #tpu.pipeline_mode<synchronous>, transform_indices = @transform_3, window_bounds = array<i64: 64, 256>}, {pipeline_mode = #tpu.pipeline_mode<synchronous>, transform_indices = @transform_4, window_bounds = array<i64: 4, 72>}, {pipeline_mode = #tpu.pipeline_mode<synchronous>, transform_indices = @transform_5, window_bounds = array<i64: 4, 1>}, {pipeline_mode = #tpu.pipeline_mode<synchronous>, transform_indices = @transform_6, window_bounds = array<i64: 4, 72>}, {pipeline_mode = #tpu.pipeline_mode<synchronous>, transform_indices = @transform_7, window_bounds = array<i64: 4, 1>}, {transform_indices = @transform_8, window_bounds = array<i64: 2, 4, 256>}]} {
    %c0 = arith.constant 0 : index
    %c0_0 = arith.constant 0 : index
    %0 = vector.load %arg3[%c0, %c0_0] : memref<3x640xbf16, #tpu.memory_space<vmem>>, vector<1x640xbf16>
    %c1 = arith.constant 1 : index
    %c0_1 = arith.constant 0 : index
    %1 = vector.load %arg3[%c1, %c0_1] : memref<3x640xbf16, #tpu.memory_space<vmem>>, vector<1x640xbf16>
    %c2 = arith.constant 2 : index
    %c0_2 = arith.constant 0 : index
    %2 = vector.load %arg3[%c2, %c0_2] : memref<3x640xbf16, #tpu.memory_space<vmem>>, vector<1x640xbf16>
    %cst = arith.constant 0.000000e+00 : bf16
    %3 = vector.broadcast %cst : bf16 to vector<8x896xbf16>
    %c0_3 = arith.constant 0 : index
    %c0_4 = arith.constant 0 : index
    %4 = vector.load %arg10[%c0_3, %c0_4] : memref<8x896xbf16, #tpu.memory_space<vmem>>, vector<8x896xbf16>
    tpu.vector_store %arg10[%c0_3, %c0_4], %3 {strides = array<i32>} : memref<8x896xbf16, #tpu.memory_space<vmem>>, vector<8x896xbf16>,
    %cst_5 = arith.constant 0.000000e+00 : bf16
    %5 = vector.broadcast %cst_5 : bf16 to vector<8x896xbf16>
    %c0_6 = arith.constant 0 : index
    %c0_7 = arith.constant 0 : index
    %6 = vector.load %arg11[%c0_6, %c0_7] : memref<8x896xbf16, #tpu.memory_space<vmem>>, vector<8x896xbf16>
    tpu.vector_store %arg11[%c0_6, %c0_7], %5 {strides = array<i32>} : memref<8x896xbf16, #tpu.memory_space<vmem>>, vector<8x896xbf16>,
    %c0_8 = arith.constant 0 : index
    %c0_9 = arith.constant 0 : index
    %c0_10 = arith.constant 0 : index
    %7 = vector.load %arg2[%c0_8, %c0_9, %c0_10] : memref<2x4x256xbf16, #tpu.memory_space<vmem>>, vector<1x4x256xbf16>
    %8 = vector.shape_cast %7 : vector<1x4x256xbf16> to vector<4x256xbf16>
    %c0_11 = arith.constant 0 : index
    %c128 = arith.constant 128 : index
    %9 = vector.load %arg10[%c0_11, %c128] : memref<8x896xbf16, #tpu.memory_space<vmem>>, vector<4x256xbf16>
    tpu.vector_store %arg10[%c0_11, %c128], %8 {strides = array<i32>} : memref<8x896xbf16, #tpu.memory_space<vmem>>, vector<4x256xbf16>,
    %c0_12 = arith.constant 0 : index
    %c0_13 = arith.constant 0 : index
    %c0_14 = arith.constant 0 : index
    %10 = vector.load %arg1[%c0_12, %c0_13, %c0_14] : memref<2x4x64xbf16, #tpu.memory_space<vmem>>, vector<1x4x64xbf16>
    %11 = vector.shape_cast %10 : vector<1x4x64xbf16> to vector<4x64xbf16>
    %c0_15 = arith.constant 0 : index
    %c0_16 = arith.constant 0 : index
    %12 = vector.load %arg4[%c0_15, %c0_16] : memref<64x256xbf16, #tpu.memory_space<vmem>>, vector<64x256xbf16>
    %cst_17 = arith.constant dense<0.000000e+00> : vector<4x256xf32>
    %13 = tpu.matmul %11, %12, %cst_17 {dimension_numbers = #tpu.dot_dimension_numbers<[1], [0], [0], [1], [0, 0, 1, 1], [], []>} : vector<4x64xbf16>, vector<64x256xbf16>, vector<4x256xf32> -> vector<4x256xf32>
    %14 = arith.truncf %13 : vector<4x256xf32> to vector<4x256xbf16>
    %c4 = arith.constant 4 : index
    %c128_18 = arith.constant 128 : index
    %15 = vector.load %arg10[%c4, %c128_18] : memref<8x896xbf16, #tpu.memory_space<vmem>>, vector<4x256xbf16>
    tpu.vector_store %arg10[%c4, %c128_18], %14 {strides = array<i32>} : memref<8x896xbf16, #tpu.memory_space<vmem>>, vector<4x256xbf16>,
    %c1_19 = arith.constant 1 : index
    %c0_20 = arith.constant 0 : index
    %c0_21 = arith.constant 0 : index
    %16 = vector.load %arg2[%c1_19, %c0_20, %c0_21] : memref<2x4x256xbf16, #tpu.memory_space<vmem>>, vector<1x4x256xbf16>
    %17 = vector.shape_cast %16 : vector<1x4x256xbf16> to vector<4x256xbf16>
    %c0_22 = arith.constant 0 : index
    %c512 = arith.constant 512 : index
    %18 = vector.load %arg10[%c0_22, %c512] : memref<8x896xbf16, #tpu.memory_space<vmem>>, vector<4x256xbf16>
    tpu.vector_store %arg10[%c0_22, %c512], %17 {strides = array<i32>} : memref<8x896xbf16, #tpu.memory_space<vmem>>, vector<4x256xbf16>,
    %c1_23 = arith.constant 1 : index
    %c0_24 = arith.constant 0 : index
    %c0_25 = arith.constant 0 : index
    %19 = vector.load %arg1[%c1_23, %c0_24, %c0_25] : memref<2x4x64xbf16, #tpu.memory_space<vmem>>, vector<1x4x64xbf16>
    %20 = vector.shape_cast %19 : vector<1x4x64xbf16> to vector<4x64xbf16>
    %c0_26 = arith.constant 0 : index
    %c0_27 = arith.constant 0 : index
    %21 = vector.load %arg4[%c0_26, %c0_27] : memref<64x256xbf16, #tpu.memory_space<vmem>>, vector<64x256xbf16>
    %cst_28 = arith.constant dense<0.000000e+00> : vector<4x256xf32>
    %22 = tpu.matmul %20, %21, %cst_28 {dimension_numbers = #tpu.dot_dimension_numbers<[1], [0], [0], [1], [0, 0, 1, 1], [], []>} : vector<4x64xbf16>, vector<64x256xbf16>, vector<4x256xf32> -> vector<4x256xf32>
    %23 = arith.truncf %22 : vector<4x256xf32> to vector<4x256xbf16>
    %c4_29 = arith.constant 4 : index
    %c512_30 = arith.constant 512 : index
    %24 = vector.load %arg10[%c4_29, %c512_30] : memref<8x896xbf16, #tpu.memory_space<vmem>>, vector<4x256xbf16>
    tpu.vector_store %arg10[%c4_29, %c512_30], %23 {strides = array<i32>} : memref<8x896xbf16, #tpu.memory_space<vmem>>, vector<4x256xbf16>,
    %c0_31 = arith.constant 0 : index
    %c0_32 = arith.constant 0 : index
    %25 = vector.load %arg5[%c0_31, %c0_32] : memref<4x72xbf16, #tpu.memory_space<vmem>>, vector<4x72xbf16>
    %c0_33 = arith.constant 0 : index
    %c111 = arith.constant 111 : index
    %26 = vector.load %arg10[%c0_33, %c111] : memref<8x896xbf16, #tpu.memory_space<vmem>>, vector<8x640xbf16>
    %27 = vector.broadcast %0 : vector<1x640xbf16> to vector<8x640xbf16>
    %28 = arith.mulf %26, %27 : vector<8x640xbf16>
    %c0_34 = arith.constant 0 : index
    %c112 = arith.constant 112 : index
    %29 = vector.load %arg10[%c0_34, %c112] : memref<8x896xbf16, #tpu.memory_space<vmem>>, vector<8x640xbf16>
    %c0_35 = arith.constant 0 : index
    %c113 = arith.constant 113 : index
    %30 = vector.load %arg10[%c0_35, %c113] : memref<8x896xbf16, #tpu.memory_space<vmem>>, vector<8x640xbf16>
    %31 = vector.broadcast %1 : vector<1x640xbf16> to vector<8x640xbf16>
    %32 = arith.mulf %30, %31 : vector<8x640xbf16>
    %c0_36 = arith.constant 0 : index
    %c127 = arith.constant 127 : index
    %33 = vector.load %arg10[%c0_36, %c127] : memref<8x896xbf16, #tpu.memory_space<vmem>>, vector<8x640xbf16>
    %34 = vector.broadcast %0 : vector<1x640xbf16> to vector<8x640xbf16>
    %35 = arith.mulf %33, %34 : vector<8x640xbf16>
    %c0_37 = arith.constant 0 : index
    %c128_38 = arith.constant 128 : index
    %36 = vector.load %arg10[%c0_37, %c128_38] : memref<8x896xbf16, #tpu.memory_space<vmem>>, vector<8x640xbf16>
    %c0_39 = arith.constant 0 : index
    %c129 = arith.constant 129 : index
    %37 = vector.load %arg10[%c0_39, %c129] : memref<8x896xbf16, #tpu.memory_space<vmem>>, vector<8x640xbf16>
    %38 = vector.broadcast %1 : vector<1x640xbf16> to vector<8x640xbf16>
    %39 = arith.mulf %37, %38 : vector<8x640xbf16>
    %c0_40 = arith.constant 0 : index
    %c143 = arith.constant 143 : index
    %40 = vector.load %arg10[%c0_40, %c143] : memref<8x896xbf16, #tpu.memory_space<vmem>>, vector<8x640xbf16>
    %41 = vector.broadcast %0 : vector<1x640xbf16> to vector<8x640xbf16>
    %42 = arith.mulf %40, %41 : vector<8x640xbf16>
    %c0_41 = arith.constant 0 : index
    %c144 = arith.constant 144 : index
    %43 = vector.load %arg10[%c0_41, %c144] : memref<8x896xbf16, #tpu.memory_space<vmem>>, vector<8x640xbf16>
    %c0_42 = arith.constant 0 : index
    %c145 = arith.constant 145 : index
    %44 = vector.load %arg10[%c0_42, %c145] : memref<8x896xbf16, #tpu.memory_space<vmem>>, vector<8x640xbf16>
    %45 = vector.broadcast %1 : vector<1x640xbf16> to vector<8x640xbf16>
    %46 = arith.mulf %44, %45 : vector<8x640xbf16>
    %47 = tpu.concatenate %28, %29, %32, %35, %36, %39, %42, %43, %46 in 0 : vector<8x640xbf16>, vector<8x640xbf16>, vector<8x640xbf16>, vector<8x640xbf16>, vector<8x640xbf16>, vector<8x640xbf16>, vector<8x640xbf16>, vector<8x640xbf16>, vector<8x640xbf16> -> vector<72x640xbf16>
    %cst_43 = arith.constant dense<0.000000e+00> : vector<4x640xf32>
    %48 = tpu.matmul %25, %47, %cst_43 {dimension_numbers = #tpu.dot_dimension_numbers<[1], [0], [0], [1], [0, 0, 1, 1], [], []>} : vector<4x72xbf16>, vector<72x640xbf16>, vector<4x640xf32> -> vector<4x640xf32>
    %c0_44 = arith.constant 0 : index
    %c0_45 = arith.constant 0 : index
    %49 = vector.load %arg6[%c0_44, %c0_45] : memref<4x1xf32, #tpu.memory_space<vmem>>, vector<4x1xf32>
    %50 = vector.broadcast %49 : vector<4x1xf32> to vector<4x640xf32>
    %51 = arith.addf %48, %50 : vector<4x640xf32>
    %cst_46 = arith.constant 0.000000e+00 : f32
    %52 = vector.broadcast %cst_46 : f32 to vector<4x640xf32>
    %53 = arith.maximumf %51, %52 : vector<4x640xf32>
    %54 = arith.extf %2 : vector<1x640xbf16> to vector<1x640xf32>
    %55 = vector.broadcast %54 : vector<1x640xf32> to vector<4x640xf32>
    %56 = arith.mulf %53, %55 : vector<4x640xf32>
    %57 = arith.truncf %56 : vector<4x640xf32> to vector<4x640xbf16>
    %c0_47 = arith.constant 0 : index
    %c128_48 = arith.constant 128 : index
    %58 = vector.load %arg11[%c0_47, %c128_48] : memref<8x896xbf16, #tpu.memory_space<vmem>>, vector<4x640xbf16>
    tpu.vector_store %arg11[%c0_47, %c128_48], %57 {strides = array<i32>} : memref<8x896xbf16, #tpu.memory_space<vmem>>, vector<4x640xbf16>,
    %c0_49 = arith.constant 0 : index
    %c0_50 = arith.constant 0 : index
    %59 = vector.load %arg7[%c0_49, %c0_50] : memref<4x72xbf16, #tpu.memory_space<vmem>>, vector<4x72xbf16>
    %c0_51 = arith.constant 0 : index
    %c111_52 = arith.constant 111 : index
    %60 = vector.load %arg11[%c0_51, %c111_52] : memref<8x896xbf16, #tpu.memory_space<vmem>>, vector<8x640xbf16>
    %61 = vector.broadcast %0 : vector<1x640xbf16> to vector<8x640xbf16>
    %62 = arith.mulf %60, %61 : vector<8x640xbf16>
    %c0_53 = arith.constant 0 : index
    %c112_54 = arith.constant 112 : index
    %63 = vector.load %arg11[%c0_53, %c112_54] : memref<8x896xbf16, #tpu.memory_space<vmem>>, vector<8x640xbf16>
    %c0_55 = arith.constant 0 : index
    %c113_56 = arith.constant 113 : index
    %64 = vector.load %arg11[%c0_55, %c113_56] : memref<8x896xbf16, #tpu.memory_space<vmem>>, vector<8x640xbf16>
    %65 = vector.broadcast %1 : vector<1x640xbf16> to vector<8x640xbf16>
    %66 = arith.mulf %64, %65 : vector<8x640xbf16>
    %c0_57 = arith.constant 0 : index
    %c127_58 = arith.constant 127 : index
    %67 = vector.load %arg11[%c0_57, %c127_58] : memref<8x896xbf16, #tpu.memory_space<vmem>>, vector<8x640xbf16>
    %68 = vector.broadcast %0 : vector<1x640xbf16> to vector<8x640xbf16>
    %69 = arith.mulf %67, %68 : vector<8x640xbf16>
    %c0_59 = arith.constant 0 : index
    %c128_60 = arith.constant 128 : index
    %70 = vector.load %arg11[%c0_59, %c128_60] : memref<8x896xbf16, #tpu.memory_space<vmem>>, vector<8x640xbf16>
    %c0_61 = arith.constant 0 : index
    %c129_62 = arith.constant 129 : index
    %71 = vector.load %arg11[%c0_61, %c129_62] : memref<8x896xbf16, #tpu.memory_space<vmem>>, vector<8x640xbf16>
    %72 = vector.broadcast %1 : vector<1x640xbf16> to vector<8x640xbf16>
    %73 = arith.mulf %71, %72 : vector<8x640xbf16>
    %c0_63 = arith.constant 0 : index
    %c143_64 = arith.constant 143 : index
    %74 = vector.load %arg11[%c0_63, %c143_64] : memref<8x896xbf16, #tpu.memory_space<vmem>>, vector<8x640xbf16>
    %75 = vector.broadcast %0 : vector<1x640xbf16> to vector<8x640xbf16>
    %76 = arith.mulf %74, %75 : vector<8x640xbf16>
    %c0_65 = arith.constant 0 : index
    %c144_66 = arith.constant 144 : index
    %77 = vector.load %arg11[%c0_65, %c144_66] : memref<8x896xbf16, #tpu.memory_space<vmem>>, vector<8x640xbf16>
    %c0_67 = arith.constant 0 : index
    %c145_68 = arith.constant 145 : index
    %78 = vector.load %arg11[%c0_67, %c145_68] : memref<8x896xbf16, #tpu.memory_space<vmem>>, vector<8x640xbf16>
    %79 = vector.broadcast %1 : vector<1x640xbf16> to vector<8x640xbf16>
    %80 = arith.mulf %78, %79 : vector<8x640xbf16>
    %81 = tpu.concatenate %62, %63, %66, %69, %70, %73, %76, %77, %80 in 0 : vector<8x640xbf16>, vector<8x640xbf16>, vector<8x640xbf16>, vector<8x640xbf16>, vector<8x640xbf16>, vector<8x640xbf16>, vector<8x640xbf16>, vector<8x640xbf16>, vector<8x640xbf16> -> vector<72x640xbf16>
    %cst_69 = arith.constant dense<0.000000e+00> : vector<4x640xf32>
    %82 = tpu.matmul %59, %81, %cst_69 {dimension_numbers = #tpu.dot_dimension_numbers<[1], [0], [0], [1], [0, 0, 1, 1], [], []>} : vector<4x72xbf16>, vector<72x640xbf16>, vector<4x640xf32> -> vector<4x640xf32>
    %83 = vector.extract_strided_slice %82 {offsets = [0, 0], sizes = [4, 256], strides = [1, 1]} : vector<4x640xf32> to vector<4x256xf32>
    %c0_70 = arith.constant 0 : index
    %c0_71 = arith.constant 0 : index
    %84 = vector.load %arg8[%c0_70, %c0_71] : memref<4x1xf32, #tpu.memory_space<vmem>>, vector<4x1xf32>
    %85 = vector.broadcast %84 : vector<4x1xf32> to vector<4x256xf32>
    %86 = arith.addf %83, %85 : vector<4x256xf32>
    %cst_72 = arith.constant 0.000000e+00 : f32
    %87 = vector.broadcast %cst_72 : f32 to vector<4x256xf32>
    %88 = arith.maximumf %86, %87 : vector<4x256xf32>
    %c0_73 = arith.constant 0 : index
    %c0_74 = arith.constant 0 : index
    %c0_75 = arith.constant 0 : index
    %89 = vector.load %arg9[%c0_73, %c0_74, %c0_75] : memref<2x4x256xf32, #tpu.memory_space<vmem>>, vector<1x4x256xf32>
    %90 = vector.shape_cast %89 : vector<1x4x256xf32> to vector<4x256xf32>
    %91 = vector.shape_cast %88 : vector<4x256xf32> to vector<1x4x256xf32>
    tpu.vector_store %arg9[%c0_73, %c0_74, %c0_75], %91 {strides = array<i32>} : memref<2x4x256xf32, #tpu.memory_space<vmem>>, vector<1x4x256xf32>,
    %92 = vector.extract_strided_slice %82 {offsets = [0, 384], sizes = [4, 256], strides = [1, 1]} : vector<4x640xf32> to vector<4x256xf32>
    %c0_76 = arith.constant 0 : index
    %c0_77 = arith.constant 0 : index
    %93 = vector.load %arg8[%c0_76, %c0_77] : memref<4x1xf32, #tpu.memory_space<vmem>>, vector<4x1xf32>
    %94 = vector.broadcast %93 : vector<4x1xf32> to vector<4x256xf32>
    %95 = arith.addf %92, %94 : vector<4x256xf32>
    %cst_78 = arith.constant 0.000000e+00 : f32
    %96 = vector.broadcast %cst_78 : f32 to vector<4x256xf32>
    %97 = arith.maximumf %95, %96 : vector<4x256xf32>
    %c1_79 = arith.constant 1 : index
    %c0_80 = arith.constant 0 : index
    %c0_81 = arith.constant 0 : index
    %98 = vector.load %arg9[%c1_79, %c0_80, %c0_81] : memref<2x4x256xf32, #tpu.memory_space<vmem>>, vector<1x4x256xf32>
    %99 = vector.shape_cast %98 : vector<1x4x256xf32> to vector<4x256xf32>
    %100 = vector.shape_cast %97 : vector<4x256xf32> to vector<1x4x256xf32>
    tpu.vector_store %arg9[%c1_79, %c0_80, %c0_81], %100 {strides = array<i32>} : memref<2x4x256xf32, #tpu.memory_space<vmem>>, vector<1x4x256xf32>,
    return
  }
  func.func @transform_0(%arg0: i32) -> (i32, i32, i32) {
    %c0_i32 = arith.constant 0 : i32
    %c0_i32_0 = arith.constant 0 : i32
    %c0_i32_1 = arith.constant 0 : i32
    return %arg0, %c0_i32, %c0_i32_0 : i32, i32, i32
  }
  func.func @transform_1(%arg0: i32) -> (i32, i32, i32) {
    %c0_i32 = arith.constant 0 : i32
    %c0_i32_0 = arith.constant 0 : i32
    %c0_i32_1 = arith.constant 0 : i32
    return %arg0, %c0_i32, %c0_i32_0 : i32, i32, i32
  }
  func.func @transform_2(%arg0: i32) -> (i32, i32) {
    %c0_i32 = arith.constant 0 : i32
    %c0_i32_0 = arith.constant 0 : i32
    %c0_i32_1 = arith.constant 0 : i32
    return %c0_i32, %c0_i32_0 : i32, i32
  }
  func.func @transform_3(%arg0: i32) -> (i32, i32) {
    %c0_i32 = arith.constant 0 : i32
    %c0_i32_0 = arith.constant 0 : i32
    %c0_i32_1 = arith.constant 0 : i32
    return %c0_i32, %c0_i32_0 : i32, i32
  }
  func.func @transform_4(%arg0: i32) -> (i32, i32) {
    %c0_i32 = arith.constant 0 : i32
    %c0_i32_0 = arith.constant 0 : i32
    %c0_i32_1 = arith.constant 0 : i32
    return %c0_i32, %c0_i32_0 : i32, i32
  }
  func.func @transform_5(%arg0: i32) -> (i32, i32) {
    %c0_i32 = arith.constant 0 : i32
    %c0_i32_0 = arith.constant 0 : i32
    %c0_i32_1 = arith.constant 0 : i32
    return %c0_i32, %c0_i32_0 : i32, i32
  }
  func.func @transform_6(%arg0: i32) -> (i32, i32) {
    %c0_i32 = arith.constant 0 : i32
    %c0_i32_0 = arith.constant 0 : i32
    %c0_i32_1 = arith.constant 0 : i32
    return %c0_i32, %c0_i32_0 : i32, i32
  }
  func.func @transform_7(%arg0: i32) -> (i32, i32) {
    %c0_i32 = arith.constant 0 : i32
    %c0_i32_0 = arith.constant 0 : i32
    %c0_i32_1 = arith.constant 0 : i32
    return %c0_i32, %c0_i32_0 : i32, i32
  }
  func.func @transform_8(%arg0: i32) -> (i32, i32, i32) {
    %c0_i32 = arith.constant 0 : i32
    %c0_i32_0 = arith.constant 0 : i32
    %c0_i32_1 = arith.constant 0 : i32
    return %arg0, %c0_i32, %c0_i32_0 : i32, i32, i32
  }
}

</mosaic_0001>

<bundles_post_ra>
// kernel: tpu_custom_call.1
= control target key start
LH: loop header
LB: loop body
LE: loop exit
PB: predicated region body
PF: predicated region fallthrough
CT: control target
= control target key end

     0   :  { %13 = vsyncpa [#allocation5], 0  ;;  %s3037_s0 = inlined_call_operand.hbm [shape: bf16[2,4,64], index: 0, kind: input, shape index: {}]   ;;  %s3038_s1 = inlined_call_operand.hbm [shape: bf16[2,4,256], index: 1, kind: input, shape index: {}]   ;;  %s3039_s2 = inlined_call_operand.vmem [shape: bf16[3,640], index: 2, kind: input, shape index: {}]   ;;  %s3040_s3 = inlined_call_operand.hbm [shape: bf16[64,256], index: 3, kind: input, shape index: {}]   ;;  %s3041_s4 = inlined_call_operand.vmem [shape: bf16[4,72], index: 4, kind: input, shape index: {}]   ;;  %s3042_s5 = inlined_call_operand.vmem [shape: f32[4,1], index: 5, kind: input, shape index: {}]   ;;  %s3043_s6 = inlined_call_operand.vmem [shape: bf16[4,72], index: 6, kind: input, shape index: {}]   ;;  %s3044_s7 = inlined_call_operand.vmem [shape: f32[4,1], index: 7, kind: input, shape index: {}]   ;;  %s3045_s8 = inlined_call_operand.hbm [shape: f32[2,4,256], index: 8, kind: output, shape index: {}]  }
   0x1   :  { %14 = vsyncpa [#allocation8], 0  ;;  %s33_s29 = sshll.u32 %s3038_s1, 4  ;;  %s34_s29 = int_to_ptr.hbm [resolvable:$true] %s33_s29 }
   0x2   :  { %15 = vsyncpa [#allocation6], 0  ;;  %s2102_s30 = smov [#allocation7]   ;;  %s20_s12 = sshll.u32 %s3037_s0, 4  ;;  %s21_s12 = int_to_ptr.hbm [resolvable:$true] %s20_s12 }
   0x3   :  { %s35_s9 = sshll.u32 %s2102_s30, 4  ;;  %s2103_s13 = smov 64   ;;  %s36_s9 = int_to_ptr.vmem [resolvable:$true] %s35_s9 }
   0x4   :  { %s2104_s14 = smov 4   ;;  %s2105_s15 = smov [#allocation4]  }
   0x5   :  { %41 = dma.hbm_to_vmem [thread:$0]  %s34_s29, 128, %s36_s9, [#allocation8], %s2103_s13, %s2103_s13, %s2104_s14  }
   0x6   :  { %s22_s16 = sshll.u32 %s2105_s15, 4  ;;  %s2106_s17 = smov 32   ;;  %s23_s16 = int_to_ptr.vmem [resolvable:$true] %s22_s16 }
   0x7   :  { %s2107_s18 = smov 2   ;;  %s48_s20 = sshll.u32 %s3040_s3, 4  ;;  %s49_s20 = int_to_ptr.hbm [resolvable:$true] %s48_s20 }
   0x8   :  { %28 = dma.hbm_to_vmem [thread:$0]  %s21_s12, 64, %s23_s16, [#allocation5], %s2106_s17, %s2106_s17, %s2107_s18  }
   0x9   :  { %s2108_s21 = smov [#allocation9]   ;;  %s2109_s23 = smov 128  }
   0xa   :  { %s50_s22 = sshll.u32 %s2108_s21, 4  ;;  %s2110_s0 = smov 8   ;;  %s51_s22 = int_to_ptr.vmem [resolvable:$true] %s50_s22 }
   0xb   :  { %56 = dma.hbm_to_vmem [thread:$0]  %s49_s20, 1024, %s51_s22, [#allocation8], %s2109_s23, %s2109_s23, %s2110_s0  }
   0xc   :  { %2096 = dma.done.wait [#allocation5], 64  }
   0xd   :  { %2097 = vsyncadd [#allocation5], 4294967232 }
   0xe   :  { %2098 = dma.done.wait [#allocation8], 1152  }
   0xf   :  { %2099 = vsyncadd [#allocation8], 4294966144  ;;  %v1848_v0 = vld [vmem:[#allocation9 + $0x30] sm:$0xf]  ;;  %v1906_v1 = vld [vmem:[#allocation9 + $0x34] sm:$0xf0] }
  0x10   :  { %v1882_v2 = vld [vmem:[#allocation9 + $0x30] sm:$0xf]  ;;  %v1849_v3 = vor.u32 %v1906_v1, %v1848_v0  ;;  %v1914_v4 = vld [vmem:[#allocation9 + $0x34] sm:$0xf0]  ;;  %v1913_v5 = vld [vmem:[#allocation9 + $0x34] sm:$0xf] }
  0x11   :  { %v1884_v6 = vld [vmem:[#allocation9 + $0x38] sm:$0xf0]  ;;  %v1883_v7 = vor.u32 %v1914_v4, %v1882_v2  ;;  %v1840_v9 = vld [vmem:[#allocation9 + $0x20] sm:$0xf]  ;;  %v1904_v10 = vld [vmem:[#allocation9 + $0x24] sm:$0xf0] }
  0x12   :  { %v1887_v8 = vor.u32 %v1913_v5, %v1884_v6  ;;  %v1874_v11 = vld [vmem:[#allocation9 + $0x20] sm:$0xf]  ;;  %153 = vmatpush.bf16.msra.mxu1 %v1849_v3  ;;  %v1841_v12 = vor.u32 %v1904_v10, %v1840_v9  ;;  %v1912_v13 = vld [vmem:[#allocation9 + $0x24] sm:$0xf0]  ;;  %v1911_v14 = vld [vmem:[#allocation9 + $0x24] sm:$0xf] }
  0x13   :  { %v1876_v15 = vld [vmem:[#allocation9 + $0x28] sm:$0xf0]  ;;  %244 = vmatpush.bf16.msra.mxu2 %v1883_v7  ;;  %v1875_v16 = vor.u32 %v1912_v13, %v1874_v11  ;;  %v1832_v18 = vld [vmem:[#allocation9 + $0x10] sm:$0xf]  ;;  %v1902_v19 = vld [vmem:[#allocation9 + $0x14] sm:$0xf0] }
  0x14   :  { %257 = vmatpush.bf16.msra.mxu3 %v1887_v8  ;;  %v1879_v17 = vor.u32 %v1911_v14, %v1876_v15  ;;  %v1866_v20 = vld [vmem:[#allocation9 + $0x10] sm:$0xf]  ;;  %v1910_v21 = vld [vmem:[#allocation9 + $0x14] sm:$0xf0]  ;;  %v1909_v22 = vld [vmem:[#allocation9 + $0x14] sm:$0xf]  ;;  %v1833_v24 = vor.u32 %v1902_v19, %v1832_v18 }
  0x15   :  { %v1868_v23 = vld [vmem:[#allocation9 + $0x18] sm:$0xf0]  ;;  %v1824_v25 = vld [vmem:[#allocation9] sm:$0xf]  ;;  %v1900_v26 = vld [vmem:[#allocation9 + $0x4] sm:$0xf0]  ;;  %v1867_v27 = vor.u32 %v1910_v21, %v1866_v20 }
  0x16   :  { %154 = vmatpush.bf16.msra.mxu1 %v1841_v12  ;;  %v1871_v28 = vor.u32 %v1909_v22, %v1868_v23  ;;  %v1858_v29 = vld [vmem:[#allocation9] sm:$0xf]  ;;  %v1908_v30 = vld [vmem:[#allocation9 + $0x4] sm:$0xf0]  ;;  %v79_v31 = vld [vmem:[%s3039_s2 + $0x8] sm:$0x1]  ;;  %v1825_v36 = vor.u32 %v1900_v26, %v1824_v25 }
  0x17   :  { %245 = vmatpush.bf16.msra.mxu2 %v1875_v16  ;;  %v1907_v32 = vld [vmem:[#allocation9 + $0x4] sm:$0xf]  ;;  %v1860_v33 = vld [vmem:[#allocation9 + $0x8] sm:$0xf0]  ;;  %279 = vst [vmem:[#allocation1 + $0x20] ss:$4 sm:$0xff] %v79_v31  ;;  %v1859_v37 = vor.u32 %v1908_v30, %v1858_v29 }
  0x18   :  { %258 = vmatpush.bf16.msra.mxu3 %v1879_v17  ;;  %v1905_v34 = vld [vmem:[#allocation9 + $0x34] sm:$0xf]  ;;  %v1850_v35 = vld [vmem:[#allocation9 + $0x38] sm:$0xf0]  ;;  %v1863_v38 = vor.u32 %v1907_v32, %v1860_v33  ;;  %v90_v39 = vld [vmem:[#allocation7] sm:$0xf] }
  0x19   :  { %v1853_v40 = vor.u32 %v1905_v34, %v1850_v35  ;;  %92 = vst [vmem:[#allocation1] ss:$2 sm:$0xff] %v90_v39  ;;  %v1903_v41 = vld [vmem:[#allocation9 + $0x24] sm:$0xf]  ;;  %v1842_v42 = vld [vmem:[#allocation9 + $0x28] sm:$0xf0] }
  0x1a   :  { %155 = vmatpush.bf16.msra.mxu1 %v1833_v24  ;;  %v96_v43 = vld [vmem:[#allocation4] sm:$0x3]  ;;  %vm145_vm0 = vcmask 523264   ;;  %v188_v45 = vld [vmem:[#allocation4 + $0x2] sm:$0x3]  ;;  %v1845_v47 = vor.u32 %v1903_v41, %v1842_v42  ;;  %s2111_s25 = smov 111  }
  0x1b   :  { %246 = vmatpush.bf16.msra.mxu2 %v1867_v27  ;;  %v1901_v48 = vld [vmem:[#allocation9 + $0x14] sm:$0xf]  ;;  %v1834_v49 = vld [vmem:[#allocation9 + $0x18] sm:$0xf0]  ;;  %v1899_v55 = vld [vmem:[#allocation9 + $0x4] sm:$0xf] }
  0x1c   :  { %259 = vmatpush.bf16.msra.mxu3 %v1871_v28  ;;  %v181_v50 = vld [vmem:[#allocation7 + $0x4] sm:$0xf]  ;;  %v1837_v54 = vor.u32 %v1901_v48, %v1834_v49  ;;  %v1826_v56 = vld [vmem:[#allocation9 + $0x8] sm:$0xf0]  ;;  %s2112_s26 = smov 127   ;;  %s2113_s29 = smov 15  }
  0x1d   :  { %v1829_v59 = vor.u32 %v1899_v55, %v1826_v56  ;;  %v78_v60 = vld [vmem:[%s3039_s2] sm:$0x55]  ;;  %s2114_s30 = smov 1   ;;  %s2115_s9 = smov 17   ;;  %v2117_v41 = vmov 0   ;;  %vm514_vm1 = vcmask 121856  }
  0x1e   :  { %156 = vmatpush.bf16.msra.mxu1 %v1825_v36  ;;  %v284_v44 = vld.sshfl [vmem:[#allocation1 + $0x20] sm:$0xff pattern:$0x73625140]  ;;  %s2116_s10 = smov 113   ;;  %84 = vst [vmem:[#allocation2 + $0x10] sm:$0xff] %v2117_v41  ;;  %1998 = vset.pattern.permute.xlu2 %v2117_v41  ;;  %s2118_s11 = smov 95  }
  0x1f   :  { %247 = vmatpush.bf16.msra.mxu2 %v1859_v37  ;;  %v297_v46 = vpack.i.b16 %v284_v44, %v284_v44  ;;  %351 = vst [vmem:[#allocation1 + $0x20] ss:$4 sm:$0xff] %v79_v31  ;;  %1999 = vset.pattern.permute.xlu0 %v2117_v41  ;;  %vm544_vm2 = vcmask 138240   ;;  %vm484_vm3 = vcmask 7168   ;;  %s2119_s12 = smov 94   ;;  %vm403_vm4 = vcmask 924672  }
  0x20   :  { %260 = vmatpush.bf16.msra.mxu3 %v1863_v38  ;;  %v2188_v52 = vld.sshfl [vmem:[#allocation1] sm:$0xff pattern:$0x75643120]  ;;  %82 = vst [vmem:[#allocation2] sm:$0xff] %v2117_v41  ;;  %vm326_vm5 = vcmask 908288   ;;  %s2120_s13 = smov 96  }
  0x21   :  { %1854 = vmatmul.msk.bf16.vlgmr.msra.gmra.mxu1 %vm145_vm0, %v96_v43  ;;  %v299_v51 = vperm.slane %v297_v46, 0  ;;  %183 = vst [vmem:[#allocation1] ss:$2 sm:$0xff] %v181_v50  ;;  %s2121_s14 = smov 110   ;;  %vm442_vm6 = vcmask 1039360   ;;  %s2122_s15 = smov 126  }
  0x22   :  { %166 = vmatpush.bf16.msrb.mxu1 %v1853_v40  ;;  %1888 = vmatmul.msk.bf16.vlgmr.msra.gmra.mxu2 %vm145_vm0, %v188_v45  ;;  %83 = vst [vmem:[#allocation2 + $0x8] sm:$0xff] %v2117_v41  ;;  %s2123_s16 = smov 112   ;;  %vm832_vm7 = vcmask 769024   ;;  %vm799_vm8 = vcmask 777216   ;;  %vm766_vm9 = vcmask 785408   ;;  %vm838_vm10 = vcmask 1043456  }
  0x23   :  { %1889 = vmatmul.msk.bf16.vlgmr.msra.gmra.mxu3 %vm145_vm0, %v188_v45  ;;  %v310_v53 = vunpack.c.l.bf16 %v299_v51  ;;  %85 = vst [vmem:[#allocation2 + $0x18] sm:$0xf] %v2117_v41  ;;  %vm733_vm11 = vcmask 900096   ;;  %vm639_vm12 = vcmask 1031168   ;;  %vm672_vm13 = vcmask 916480  }
  0x24   :  { %86 = vst [vmem:[#allocation3] sm:$0xff] %v2117_v41  ;;  %vm1047_vm14 = vcmask 588800  }
  0x25   :  { %324 = vrot.lane.b32.xlu1 %v310_v53, %s2111_s25  ;;  %440 = vrot.lane.b32.xlu2 %v310_v53, %s2112_s26  ;;  %87 = vst [vmem:[#allocation3 + $0x8] sm:$0xff] %v2117_v41 }
  0x26   :  { %167 = vmatpush.bf16.msrb.mxu1 %v1845_v47  ;;  %v356_v57 = vld.sshfl [vmem:[#allocation1 + $0x20] sm:$0xff pattern:$0x73625140]  ;;  %88 = vst [vmem:[#allocation3 + $0x10] sm:$0xff] %v2117_v41 }
  0x27   :  { %v373_v58 = vshrl.u32 %v356_v57, 16  ;;  %89 = vst [vmem:[#allocation3 + $0x18] sm:$0xf] %v2117_v41 }
  0x28   :  { %v2195_v62 = vld.sshfl [vmem:[#allocation1] sm:$0xff pattern:$0x75643120]  ;;  %95 = vst [vmem:[#allocation2 + $0x4] sm:$0x33] %v2188_v52 }
  0x29   :  { %v374_v61 = vpack.i.b16 %v373_v58, %v373_v58  ;;  %276 = vst [vmem:[#allocation1] ss:$4 sm:$0xff] %v78_v60 }
  0x2a   :  { %168 = vmatpush.bf16.msrb.mxu1 %v1837_v54  ;;  %186 = vst [vmem:[#allocation2 + $0x10] sm:$0x33] %v2195_v62 }
  0x2b   :  { %v376_v63 = vperm.slane %v374_v61, 0 }
  0x2d   :  { %v387_v0 = vunpack.c.l.bf16 %v376_v63  ;;  %512 = vrot.lane.b32.xlu1 %v310_v53, %s2113_s29 }
  0x2e   :  { %169 = vmatpush.bf16.msrb.mxu1 %v1829_v59 }
  0x2f   :  { %482 = vrot.lane.b32.xlu0 %v387_v0, %s2114_s30 }
  0x30   :  { %v280_v1 = vld.sshfl [vmem:[#allocation1] sm:$0xff pattern:$0x73625140]  ;;  %v281_v2 = vld.sshfl [vmem:[#allocation1 + $0x8] sm:$0xff pattern:$0x73625140] }
  0x31   :  { %1855 = vmatmul.msk.bf16.vlgmr.msrb.gmra.mxu1 %vm145_vm0, %v96_v43  ;;  %v285_v3 = vpack.i.b16 %v280_v1, %v280_v1  ;;  %v288_v4 = vpack.i.b16 %v281_v2, %v281_v2  ;;  %v282_v5 = vld.sshfl [vmem:[#allocation1 + $0x10] sm:$0xff pattern:$0x73625140]  ;;  %v283_v6 = vld.sshfl [vmem:[#allocation1 + $0x18] sm:$0xff pattern:$0x73625140] }
  0x32   :  { %v291_v7 = vpack.i.b16 %v282_v5, %v282_v5  ;;  %v294_v8 = vpack.i.b16 %v283_v6, %v283_v6  ;;  %349 = vst [vmem:[#allocation1] ss:$4 sm:$0xff] %v78_v60 }
  0x33   :  { %v287_v9 = vperm.slane %v285_v3, 0  ;;  %v290_v10 = vperm.slane %v288_v4, 0 }
  0x34   :  { %v293_v13 = vperm.slane %v291_v7, 0  ;;  %v296_v14 = vperm.slane %v294_v8, 0 }
  0x35   :  { %542 = vrot.lane.b32.xlu1 %v387_v0, %s2115_s9  ;;  %v306_v11 = vunpack.c.l.bf16 %v287_v9  ;;  %v307_v12 = vunpack.c.l.bf16 %v290_v10 }
  0x36   :  { %v308_v16 = vunpack.c.l.bf16 %v293_v13  ;;  %v309_v17 = vunpack.c.l.bf16 %v296_v14 }
  0x37   :  { %v1948_v15 = vpack.i.bf16 %v307_v12, %v306_v11 }
  0x38   :  { %v1958_v26 = vpack.i.bf16 %v309_v17, %v308_v16 }
  0x39   :  { %1949 = vrot.lane.b32.xlu2 %v1948_v15, %s2113_s29  ;;  %1939 = vrot.lane.b32.xlu0 %v1948_v15, %s2111_s25  ;;  %v352_v18 = vld.sshfl [vmem:[#allocation1] sm:$0xff pattern:$0x73625140]  ;;  %v353_v19 = vld.sshfl [vmem:[#allocation1 + $0x8] sm:$0xff pattern:$0x73625140] }
  0x3a   :  { %v357_v20 = vshrl.u32 %v352_v18, 16  ;;  %v361_v21 = vshrl.u32 %v353_v19, 16  ;;  %v354_v22 = vld.sshfl [vmem:[#allocation1 + $0x10] sm:$0xff pattern:$0x73625140] }
  0x3b   :  { %v355_v23 = vld.sshfl [vmem:[#allocation1 + $0x18] sm:$0xff pattern:$0x73625140]  ;;  %v365_v27 = vshrl.u32 %v354_v22, 16 }
  0x3c   :  { %v358_v24 = vpack.i.b16 %v357_v20, %v357_v20  ;;  %v362_v25 = vpack.i.b16 %v361_v21, %v361_v21  ;;  %v369_v28 = vshrl.u32 %v355_v23, 16 }
  0x3d   :  { %401 = vrot.lane.b32.xlu1 %v387_v0, %s2116_s10  ;;  %v366_v33 = vpack.i.b16 %v365_v27, %v365_v27 }
  0x3e   :  { %v360_v29 = vperm.slane %v358_v24, 0  ;;  %v364_v30 = vperm.slane %v362_v25, 0  ;;  %v370_v34 = vpack.i.b16 %v369_v28, %v369_v28 }
  0x3f   :  { %v368_v36 = vperm.slane %v366_v33, 0 }
  0x40   :  { %v383_v31 = vunpack.c.l.bf16 %v360_v29  ;;  %v384_v32 = vunpack.c.l.bf16 %v364_v30  ;;  %v372_v37 = vperm.slane %v370_v34, 0 }
  0x41   :  { %1959 = vrot.lane.b32.xlu2 %v1958_v26, %s2112_s26  ;;  %1944 = vrot.lane.b32.xlu0 %v1958_v26, %s2111_s25  ;;  %v385_v38 = vunpack.c.l.bf16 %v368_v36 }
  0x42   :  { %v1973_v35 = vpack.i.bf16 %v384_v32, %v383_v31  ;;  %v386_v39 = vunpack.c.l.bf16 %v372_v37 }
  0x44   :  { %v1978_v40 = vpack.i.bf16 %v386_v39, %v385_v38 }
  0x45   :  { %1954 = vrot.lane.b32.xlu1 %v1948_v15, %s2112_s26 }
  0x49   :  { %1974 = vrot.lane.b32.xlu2 %v1973_v35, %s2114_s30  ;;  %1964 = vrot.lane.b32.xlu0 %v1958_v26, %s2113_s29  ;;  %s1808_s29 = sshll.u32 %s3045_s8, 4  ;;  %s1809_s29 = int_to_ptr.hbm [resolvable:$true] %s1808_s29 }
  0x4d   :  { %1969 = vrot.lane.b32.xlu1 %v1973_v35, %s2115_s9 }
  0x51   :  { %1984 = vrot.lane.b32.xlu2 %v1973_v35, %s2116_s10  ;;  %1979 = vrot.lane.b32.xlu0 %v1978_v40, %s2115_s9 }
  0x59   :  { %1994 = vrot.lane.b32.xlu2 %v1978_v40, %s2114_s30  ;;  %1989 = vrot.lane.b32.xlu0 %v1978_v40, %s2116_s10 }
  0x7f   :  { %v2214_v43 = vpop.permute.xlu2 %440 }
  0x80   :  { %3052 = vst [vmem:[#allocation14_spill] sm:$0xff] %v2214_v43 }
  0x93   :  { %v2219_v46 = vpop.permute.xlu2 %1949 }
  0x94   :  { %v1952_v19 = vunpack.i.h.bf16 %v2219_v46 }
  0x97   :  { %v2212_v42 = vpop.permute.xlu1 %324 }
  0x9b   :  { %v2225_v57 = vpop.permute.xlu2 %1959 }
  0x9e   :  { %v158_v44 = vpop.f32.mrf.mxu1 }
  0x9f   :  { %v2217_v45 = vpop.permute.xlu1 %512 }
  0xa0   :  { %3053 = vst [vmem:[#allocation15_spill] sm:$0xff] %v2217_v45 }
  0xa1   :  { %v2221_v47 = vpop.permute.xlu0 %482 }
  0xa3   :  { %v2235_v9 = vpop.permute.xlu2 %1974 }
  0xa5   :  { %v249_v48 = vpop.f32.mrf.mxu2 }
  0xa6   :  { %v262_v49 = vpop.f32.mrf.mxu3  ;;  %v160_v51 = vpop.f32.mrf.mxu1 }
  0xa7   :  { %v266_v50 = vpack.c.bf16 %v262_v49, %v249_v48  ;;  %v2223_v53 = vpop.permute.xlu1 %542  ;;  %v1977_v51 = vunpack.i.h.bf16 %v2235_v9 }
  0xa9   :  { %v268_v54 = vrot.slane %v266_v50, 6 }
  0xab   :  { %270 = vst [vmem:[#allocation2 + $0x10] sm:$0xcc] %v268_v54  ;;  %v2227_v52 = vpop.permute.xlu0 %1939  ;;  %v2246_v16 = vpop.permute.xlu2 %1984 }
  0xad   :  { %v251_v55 = vpop.f32.mrf.mxu2 }
  0xae   :  { %v264_v56 = vpop.f32.mrf.mxu3  ;;  %v171_v58 = vpop.f32.mrf.mxu1 }
  0xaf   :  { %v2229_v59 = vpop.permute.xlu1 %401  ;;  %v175_v60 = vpack.c.bf16 %v171_v58, %v158_v44 }
  0xb0   :  { %3054 = vst [vmem:[#allocation16_spill] sm:$0xff] %v2229_v59 }
  0xb1   :  { %v177_v63 = vrot.slane %v175_v60, 6 }
  0xb2   :  { %v466_v61 = vld [vmem:[#allocation2 + $0xc] sm:$0xff]  ;;  %v467_v62 = vld [vmem:[#allocation2 + $0x14] sm:$0xff] }
  0xb3   :  { %v777_v0 = vunpack.c.l.b16 %v466_v61  ;;  %v778_v1 = vunpack.c.h.b16 %v466_v61  ;;  %179 = vst [vmem:[#allocation2 + $0x4] sm:$0xcc] %v177_v63  ;;  %v779_v2 = vunpack.c.l.b16 %v467_v62  ;;  %v2231_v5 = vpop.permute.xlu0 %1944  ;;  %v464_v7 = vld [vmem:[#allocation2 + $0x14] sm:$0xf]  ;;  %v780_v18 = vunpack.c.h.b16 %v467_v62  ;;  %v1995_v41 = vpop.permute.xlu2 %1994 }
  0xb4   :  { %v685_v11 = vunpack.c.l.b16 %v464_v7  ;;  %v2240_v13 = vld [vmem:[#allocation2 + $0x10] sm:$0xff]  ;;  %v470_v26 = vunpack.c.l.bf16 %v466_v61  ;;  %v471_v30 = vunpack.c.h.bf16 %v466_v61  ;;  %v2258_v31 = vunpack.c.l.bf16 %v467_v62 }
  0xb5   :  { %v783_v3 = vpack.c.b16 %v777_v0, %v777_v0  ;;  %v784_v4 = vpack.c.b16 %v778_v1, %v778_v1  ;;  %v785_v6 = vpack.c.b16 %v779_v2, %v779_v2  ;;  %v587_v15 = vunpack.c.h.b16 %v2240_v13 }
  0xb6   :  { %v173_v8 = vpop.f32.mrf.mxu1  ;;  %v690_v12 = vpack.c.b16 %v685_v11, %v685_v11  ;;  %v786_v25 = vpack.c.b16 %v780_v18, %v780_v18  ;;  %v2260_v32 = vunpack.c.h.bf16 %v467_v62  ;;  %v586_v39 = vunpack.c.l.b16 %v2240_v13 }
  0xb7   :  { %791 = vrot.lane.b32.xlu1 %v783_v3, %s2118_s11  ;;  %793 = vrot.lane.b32.xlu2 %v784_v4, %s2118_s11  ;;  %v2237_v10 = vpop.permute.xlu1 %1954  ;;  %v593_v23 = vpack.c.b16 %v587_v15, %v587_v15  ;;  %v1996_v54 = vunpack.i.l.bf16 %v1995_v41  ;;  %v1997_v61 = vunpack.i.h.bf16 %v1995_v41  ;;  %v1942_v7 = vunpack.i.h.bf16 %v2227_v52 }
  0xb8   :  { %795 = vrot.lane.b32.xlu0 %v785_v6, %s2118_s11  ;;  %v560_v50 = vmul.f32 %v2223_v53, %v2260_v32  ;;  %v592_v56 = vpack.c.b16 %v586_v39, %v586_v39  ;;  %v2310_v8 = vunpack.i.l.bf16 %v2227_v52  ;;  %v530_v11 = vmul.f32 %v2217_v45, %v2260_v32 }
  0xb9   :  { %v2298_v2 = vsel %vm484_vm3, %v1977_v51, %v1996_v54  ;;  %v304_v52 = vunpack.c.l.bf16 %v2240_v13 }
  0xba   :  { %v497_v18 = vmul.f32 %v2298_v2, %v470_v26 }
  0xbb   :  { %v1965_v14 = vpop.permute.xlu0 %1964 }
  0xbc   :  { %v1966_v20 = vunpack.i.l.bf16 %v1965_v14  ;;  %v1967_v21 = vunpack.i.h.bf16 %v1965_v14 }
  0xbe   :  { %v2256_v29 = vsel %vm514_vm1, %v1952_v19, %v1966_v20  ;;  %v2264_v33 = vsel %vm514_vm1, %v1966_v20, %v1967_v21  ;;  %v2292_v62 = vsel %vm514_vm1, %v1967_v21, %v2217_v45  ;;  %v1947_v21 = vunpack.i.h.bf16 %v2231_v5 }
  0xbf   :  { %699 = vrot.lane.b32.xlu1 %v690_v12, %s2111_s25  ;;  %695 = vrot.lane.b32.xlu2 %v783_v3, %s2111_s25  ;;  %v2248_v17 = vpop.permute.xlu1 %1969  ;;  %v527_v48 = vmul.f32 %v2256_v29, %v470_v26  ;;  %v528_v49 = vmul.f32 %v2264_v33, %v471_v30  ;;  %3055 = vst [vmem:[#allocation17_spill] sm:$0xff] %v2292_v62  ;;  %v2314_v12 = vld [vmem:[#allocation2] sm:$0xff] }
  0xc0   :  { %697 = vrot.lane.b32.xlu0 %v784_v4, %s2111_s25  ;;  %v1972_v22 = vunpack.i.h.bf16 %v2248_v17  ;;  %v2301_v3 = vsel %vm484_vm3, %v1996_v54, %v1997_v61  ;;  %v529_v6 = vmul.f32 %v2292_v62, %v2258_v31  ;;  %v2335_v41 = vunpack.c.h.bf16 %v2314_v12 }
  0xc1   :  { %v532_v1 = vpack.c.bf16 %v528_v49, %v527_v48  ;;  %v498_v20 = vmul.f32 %v2301_v3, %v471_v30  ;;  %v2345_v48 = vsel %vm484_vm3, %v1997_v61, %v2221_v47  ;;  %v2349_v49 = vsel %vm326_vm5, %v1947_v21, %v2212_v42 }
  0xc2   :  { %v341_v54 = vmul.f32 %v2349_v49, %v304_v52 }
  0xc3   :  { %v1980_v24 = vpop.permute.xlu0 %1979  ;;  %v745_v14 = vunpack.c.h.b16 %v532_v1  ;;  %v744_v15 = vunpack.c.l.b16 %v532_v1  ;;  %v502_v39 = vpack.c.bf16 %v498_v20, %v497_v18  ;;  %v500_v1 = vmul.f32 %v2221_v47, %v2260_v32 }
  0xc4   :  { %v1982_v27 = vunpack.i.h.bf16 %v1980_v24  ;;  %v1981_v28 = vunpack.i.l.bf16 %v1980_v24  ;;  %v533_v24 = vpack.c.bf16 %v530_v11, %v529_v6 }
  0xc5   :  { %v711_v61 = vunpack.c.l.b16 %v502_v39 }
  0xc6   :  { %v2268_v34 = vsel %vm544_vm2, %v1982_v27, %v2223_v53  ;;  %v2273_v35 = vsel %vm544_vm2, %v1972_v22, %v1981_v28  ;;  %v2276_v36 = vsel %vm544_vm2, %v1981_v28, %v1982_v27  ;;  %v1946_v27 = vunpack.i.l.bf16 %v2231_v5 }
  0xc7   :  { %604 = vrot.lane.b32.xlu1 %v593_v23, %s2112_s26  ;;  %v557_v37 = vmul.f32 %v2273_v35, %v470_v26  ;;  %v558_v38 = vmul.f32 %v2276_v36, %v471_v30  ;;  %v559_v40 = vmul.f32 %v2268_v34, %v2258_v31  ;;  %v2324_v28 = vunpack.c.l.bf16 %v2314_v12 }
  0xc8   :  { %797 = vrot.lane.b32.xlu0 %v786_v25, %s2118_s11  ;;  %v2319_v25 = vld [vmem:[#allocation2 + $0x8] sm:$0xff]  ;;  %v2328_v26 = vsel %vm326_vm5, %v2310_v8, %v1942_v7  ;;  %v717_v18 = vpack.c.b16 %v711_v61, %v711_v61 }
  0xc9   :  { %v562_v44 = vpack.c.bf16 %v558_v38, %v557_v37  ;;  %v2288_v60 = vpack.c.bf16 %v560_v50, %v559_v40  ;;  %v751_v37 = vpack.c.b16 %v745_v14, %v745_v14  ;;  %v750_v38 = vpack.c.b16 %v744_v15, %v744_v15 }
  0xca   :  { %v382_v40 = vunpack.c.h.bf16 %v2240_v13  ;;  %v2338_v5 = vunpack.c.l.bf16 %v2319_v25  ;;  %v2352_v50 = vsel %vm326_vm5, %v1946_v27, %v1947_v21  ;;  %v746_v13 = vunpack.c.l.b16 %v533_v24 }
  0xcb   :  { %v811_v55 = vunpack.c.h.b16 %v562_v44  ;;  %v810_v58 = vunpack.c.l.b16 %v562_v44  ;;  %v812_v4 = vunpack.c.l.b16 %v2288_v60  ;;  %v2330_v30 = vpop.permute.xlu0 %1989  ;;  %v2341_v44 = vunpack.c.h.bf16 %v2319_v25 }
  0xcc   :  { %v342_v11 = vmul.f32 %v382_v40, %v2212_v42  ;;  %v752_v14 = vpack.c.b16 %v746_v13, %v746_v13  ;;  %v747_v13 = vunpack.c.h.b16 %v533_v24 }
  0xcd   :  { %v817_v63 = vpack.c.b16 %v811_v55, %v811_v55  ;;  %v816_v0 = vpack.c.b16 %v810_v58, %v810_v58  ;;  %v818_v23 = vpack.c.b16 %v812_v4, %v812_v4  ;;  %v2358_v55 = vsel %vm326_vm5, %v1942_v7, %v1946_v27 }
  0xce   :  { %v337_v58 = vmul.f32 %v2310_v8, %v2324_v28  ;;  %v338_v4 = vmul.f32 %v2335_v41, %v2328_v26  ;;  %v339_v6 = vmul.f32 %v2338_v5, %v2358_v55  ;;  %v340_v7 = vmul.f32 %v2341_v44, %v2352_v50 }
  0xcf   :  { %826 = vrot.lane.b32.xlu2 %v817_v63, %s2119_s12  ;;  %824 = vrot.lane.b32.xlu1 %v816_v0, %s2119_s12  ;;  %v813_v63 = vunpack.c.h.b16 %v2288_v60  ;;  %v499_v0 = vmul.f32 %v2345_v48, %v2258_v31  ;;  %v2385_v15 = vpack.c.bf16 %v342_v11, %v341_v54 }
  0xd0   :  { %602 = vrot.lane.b32.xlu0 %v592_v56, %s2112_s26  ;;  %v1992_v56 = vunpack.i.h.bf16 %v2330_v30  ;;  %v2381_v60 = vpack.c.bf16 %v338_v4, %v337_v58  ;;  %v2383_v32 = vpack.c.bf16 %v340_v7, %v339_v6  ;;  %v458_v4 = vmul.f32 %v2214_v43, %v382_v40 }
  0xd1   :  { %v819_v20 = vpack.c.b16 %v813_v63, %v813_v63  ;;  %v503_v21 = vpack.c.bf16 %v500_v1, %v499_v0  ;;  %v753_v0 = vpack.c.b16 %v747_v13, %v747_v13 }
  0xd2   :  { %v2379_v31 = vsel %vm403_vm4, %v1992_v56, %v2229_v59 }
  0xd3   :  { %3056 = vst [vmem:[#allocation18_spill] sm:$0xff] %v2379_v31  ;;  %v418_v27 = vmul.f32 %v2379_v31, %v304_v52  ;;  %v713_v54 = vunpack.c.l.b16 %v503_v21  ;;  %v714_v7 = vunpack.c.h.b16 %v503_v21  ;;  %v2411_v21 = vunpack.i.l.bf16 %v2248_v17 }
  0xd4   :  { %v2426_v17 = vunpack.i.l.bf16 %v2219_v46 }
  0xd7   :  { %760 = vrot.lane.b32.xlu2 %v751_v37, %s2120_s13  ;;  %758 = vrot.lane.b32.xlu1 %v750_v38, %s2120_s13  ;;  %v1962_v37 = vunpack.i.h.bf16 %v2225_v57  ;;  %v419_v38 = vmul.f32 %v2229_v59, %v382_v40 }
  0xd8   :  { %828 = vrot.lane.b32.xlu0 %v818_v23, %s2119_s12  ;;  %v712_v23 = vunpack.c.h.b16 %v502_v39  ;;  %v719_v39 = vpack.c.b16 %v713_v54, %v713_v54 }
  0xd9   :  { %v422_v61 = vpack.c.bf16 %v419_v38, %v418_v27  ;;  %v2397_v63 = vsel %vm442_vm6, %v1962_v37, %v2214_v43  ;;  %v465_v27 = vld [vmem:[#allocation2 + $0x4] sm:$0xff] }
  0xda   :  { %v718_v58 = vpack.c.b16 %v712_v23, %v712_v23  ;;  %3057 = vst [vmem:[#allocation19_spill] sm:$0xff] %v2397_v63  ;;  %v457_v24 = vmul.f32 %v2397_v63, %v304_v52  ;;  %v775_v13 = vunpack.c.l.b16 %v465_v27 }
  0xdb   :  { %v620_v1 = vunpack.c.h.b16 %v422_v61  ;;  %v619_v6 = vunpack.c.l.b16 %v422_v61  ;;  %v2417_v61 = vsel %vm544_vm2, %v2411_v21, %v1972_v22  ;;  %v583_v22 = vunpack.c.h.b16 %v2314_v12 }
  0xdc   :  { %v781_v40 = vpack.c.b16 %v775_v13, %v775_v13 }
  0xdd   :  { %v626_v11 = vpack.c.b16 %v620_v1, %v620_v1  ;;  %v469_v1 = vunpack.c.h.bf16 %v465_v27 }
  0xdf   :  { %725 = vrot.lane.b32.xlu2 %v717_v18, %s2121_s14  ;;  %830 = vrot.lane.b32.xlu1 %v819_v20, %s2119_s12  ;;  %v625_v18 = vpack.c.b16 %v619_v6, %v619_v6  ;;  %v720_v20 = vpack.c.b16 %v714_v7, %v714_v7  ;;  %v556_v6 = vmul.f32 %v2417_v61, %v469_v1  ;;  %v582_v7 = vunpack.c.l.b16 %v2314_v12 }
  0xe0   :  { %762 = vrot.lane.b32.xlu0 %v752_v14, %s2120_s13  ;;  %v461_v14 = vpack.c.bf16 %v458_v4, %v457_v24  ;;  %v584_v4 = vunpack.c.l.b16 %v2319_v25 }
  0xe2   :  { %v653_v23 = vunpack.c.h.b16 %v461_v14  ;;  %v652_v38 = vunpack.c.l.b16 %v461_v14  ;;  %v2432_v14 = vunpack.i.l.bf16 %v2246_v16 }
  0xe4   :  { %v659_v52 = vpack.c.b16 %v653_v23, %v653_v23  ;;  %v658_v54 = vpack.c.b16 %v652_v38, %v652_v38  ;;  %v2438_v23 = vsel %vm514_vm1, %v2426_v17, %v1952_v19  ;;  %v588_v38 = vpack.c.b16 %v582_v7, %v582_v7 }
  0xe5   :  { %v526_v46 = vmul.f32 %v2438_v23, %v469_v1  ;;  %v2450_v19 = vunpack.i.l.bf16 %v2235_v9 }
  0xe7   :  { %764 = vrot.lane.b32.xlu2 %v753_v0, %s2120_s13  ;;  %729 = vrot.lane.b32.xlu1 %v719_v39, %s2121_s14  ;;  %v468_v0 = vunpack.c.l.bf16 %v465_v27 }
  0xe8   :  { %727 = vrot.lane.b32.xlu0 %v718_v58, %s2121_s14  ;;  %v776_v58 = vunpack.c.h.b16 %v465_v27  ;;  %v589_v27 = vpack.c.b16 %v583_v22, %v583_v22 }
  0xe9   :  { %v555_v24 = vmul.f32 %v2411_v21, %v468_v0  ;;  %v525_v13 = vmul.f32 %v2426_v17, %v468_v0 }
  0xea   :  { %v782_v39 = vpack.c.b16 %v776_v58, %v776_v58 }
  0xef   :  { %635 = vrot.lane.b32.xlu2 %v625_v18, %s2122_s15  ;;  %731 = vrot.lane.b32.xlu1 %v720_v20, %s2121_s14  ;;  %v590_v18 = vpack.c.b16 %v584_v4, %v584_v4  ;;  %v561_v20 = vpack.c.bf16 %v556_v6, %v555_v24  ;;  %v531_v4 = vpack.c.bf16 %v526_v46, %v525_v13 }
  0xf0   :  { %637 = vrot.lane.b32.xlu0 %v626_v11, %s2122_s15  ;;  %v1987_v11 = vunpack.i.h.bf16 %v2246_v16  ;;  %v2464_v6 = vsel %vm484_vm3, %v2450_v19, %v1977_v51 }
  0xf1   :  { %v808_v16 = vunpack.c.l.b16 %v561_v20  ;;  %v743_v9 = vunpack.c.h.b16 %v531_v4  ;;  %v496_v51 = vmul.f32 %v2464_v6, %v469_v1 }
  0xf2   :  { %v2443_v12 = vsel %vm403_vm4, %v2432_v14, %v1987_v11 }
  0xf3   :  { %v415_v58 = vmul.f32 %v2443_v12, %v2335_v41  ;;  %v814_v24 = vpack.c.b16 %v808_v16, %v808_v16  ;;  %v742_v16 = vunpack.c.l.b16 %v531_v4 }
  0xf5   :  { %v748_v1 = vpack.c.b16 %v742_v16, %v742_v16 }
  0xf7   :  { %668 = vrot.lane.b32.xlu2 %v658_v54, %s2123_s16  ;;  %787 = vrot.lane.b32.xlu1 %v781_v40, %s2118_s11  ;;  %v809_v54 = vunpack.c.h.b16 %v561_v20 }
  0xf8   :  { %670 = vrot.lane.b32.xlu0 %v659_v52, %s2123_s16  ;;  %v585_v52 = vunpack.c.h.b16 %v2319_v25  ;;  %v1957_v25 = vunpack.i.h.bf16 %v2237_v10 }
  0xf9   :  { %v815_v7 = vpack.c.b16 %v809_v54, %v809_v54 }
  0xfa   :  { %v591_v22 = vpack.c.b16 %v585_v52, %v585_v52  ;;  %v749_v52 = vpack.c.b16 %v743_v9, %v743_v9 }
  0xff   :  { %789 = vrot.lane.b32.xlu2 %v782_v39, %s2118_s11  ;;  %693 = vrot.lane.b32.xlu1 %v782_v39, %s2111_s25  ;;  %v2458_v39 = vunpack.i.l.bf16 %v2237_v10  ;;  %v1991_v10 = vunpack.i.l.bf16 %v2330_v30 }
 0x100   :  { %691 = vrot.lane.b32.xlu0 %v781_v40, %s2111_s25  ;;  %v414_v40 = vmul.f32 %v2432_v14, %v2324_v28 }
 0x101   :  { %v2470_v20 = vsel %vm442_vm6, %v2458_v39, %v1957_v25 }
 0x102   :  { %v454_v46 = vmul.f32 %v2470_v20, %v2335_v41 }
 0x107   :  { %596 = vrot.lane.b32.xlu2 %v589_v27, %s2112_s26  ;;  %594 = vrot.lane.b32.xlu1 %v588_v38, %s2112_s26  ;;  %v495_v27 = vmul.f32 %v2450_v19, %v468_v0  ;;  %v453_v38 = vmul.f32 %v2458_v39, %v2324_v28  ;;  %v2487_v0 = vsel %vm403_vm4, %v1991_v10, %v1992_v56  ;;  %v1961_v56 = vunpack.i.l.bf16 %v2225_v57 }
 0x108   :  { %598 = vrot.lane.b32.xlu0 %v590_v18, %s2112_s26  ;;  %v420_v18 = vpack.c.bf16 %v415_v58, %v414_v40  ;;  %v2482_v40 = vsel %vm403_vm4, %v1987_v11, %v1991_v10  ;;  %v417_v30 = vmul.f32 %v2487_v0, %v2341_v44 }
 0x109   :  { %v501_v54 = vpack.c.bf16 %v496_v51, %v495_v27  ;;  %v416_v11 = vmul.f32 %v2482_v40, %v2338_v5  ;;  %v2502_v27 = vsel %vm442_vm6, %v1961_v56, %v1962_v37  ;;  %v2505_v51 = vsel %vm442_vm6, %v1957_v25, %v1961_v56 }
 0x10a   :  { %v615_v13 = vunpack.c.l.b16 %v420_v18  ;;  %v455_v57 = vmul.f32 %v2505_v51, %v2338_v5  ;;  %v456_v37 = vmul.f32 %v2502_v27, %v2341_v44 }
 0x10b   :  { %v710_v41 = vunpack.c.h.b16 %v501_v54  ;;  %v709_v4 = vunpack.c.l.b16 %v501_v54  ;;  %v421_v9 = vpack.c.bf16 %v417_v30, %v416_v11 }
 0x10c   :  { %v621_v28 = vpack.c.b16 %v615_v13, %v615_v13  ;;  %v460_v54 = vpack.c.bf16 %v456_v37, %v455_v57 }
 0x10d   :  { %v715_v10 = vpack.c.b16 %v709_v4, %v709_v4  ;;  %v617_v13 = vunpack.c.l.b16 %v421_v9  ;;  %v618_v25 = vunpack.c.h.b16 %v421_v9 }
 0x10e   :  { %v650_v30 = vunpack.c.l.b16 %v460_v54  ;;  %v651_v4 = vunpack.c.h.b16 %v460_v54 }
 0x10f   :  { %600 = vrot.lane.b32.xlu2 %v591_v22, %s2112_s26  ;;  %822 = vrot.lane.b32.xlu1 %v815_v7, %s2119_s12  ;;  %v716_v7 = vpack.c.b16 %v710_v41, %v710_v41 }
 0x110   :  { %820 = vrot.lane.b32.xlu0 %v814_v24, %s2119_s12  ;;  %v459_v24 = vpack.c.bf16 %v454_v46, %v453_v38  ;;  %v616_v46 = vunpack.c.h.b16 %v420_v18  ;;  %v656_v44 = vpack.c.b16 %v650_v30, %v650_v30 }
 0x111   :  { %v2489_v58 = vpop.permute.xlu2 %793 }
 0x112   :  { %v648_v22 = vunpack.c.l.b16 %v459_v24  ;;  %v649_v56 = vunpack.c.h.b16 %v459_v24 }
 0x114   :  { %v654_v38 = vpack.c.b16 %v648_v22, %v648_v22  ;;  %v655_v18 = vpack.c.b16 %v649_v56, %v649_v56  ;;  %v657_v22 = vpack.c.b16 %v651_v4, %v651_v4 }
 0x117   :  { %754 = vrot.lane.b32.xlu2 %v748_v1, %s2120_s13  ;;  %627 = vrot.lane.b32.xlu1 %v621_v28, %s2122_s15  ;;  %v622_v1 = vpack.c.b16 %v616_v46, %v616_v46  ;;  %v624_v28 = vpack.c.b16 %v618_v25, %v618_v25 }
 0x118   :  { %756 = vrot.lane.b32.xlu0 %v749_v52, %s2120_s13  ;;  %v623_v52 = vpack.c.b16 %v617_v13, %v617_v13 }
 0x119   :  { %v2509_v16 = vpop.permute.xlu2 %695 }
 0x11f   :  { %721 = vrot.lane.b32.xlu2 %v715_v10, %s2121_s14  ;;  %660 = vrot.lane.b32.xlu1 %v654_v38, %s2123_s16 }
 0x120   :  { %723 = vrot.lane.b32.xlu0 %v716_v7, %s2121_s14 }
 0x127   :  { %629 = vrot.lane.b32.xlu2 %v622_v1, %s2122_s15  ;;  %633 = vrot.lane.b32.xlu1 %v624_v28, %s2122_s15 }
 0x128   :  { %631 = vrot.lane.b32.xlu0 %v623_v52, %s2122_s15 }
 0x129   :  { %v2517_v41 = vpop.permute.xlu1 %791  ;;  %v827_v5 = vpop.permute.xlu2 %826 }
 0x12a   :  { %v796_v11 = vpop.permute.xlu0 %795  ;;  %v802_v30 = vsel %vm799_vm8, %v2517_v41, %v2489_v58 }
 0x12f   :  { %662 = vrot.lane.b32.xlu2 %v655_v18, %s2123_s16  ;;  %666 = vrot.lane.b32.xlu1 %v657_v22, %s2123_s16 }
 0x130   :  { %664 = vrot.lane.b32.xlu0 %v656_v44, %s2123_s16 }
 0x131   :  { %v700_v7 = vpop.permute.xlu1 %699  ;;  %v761_v10 = vpop.permute.xlu2 %760 }
 0x132   :  { %v698_v9 = vpop.permute.xlu0 %697 }
 0x139   :  { %v2524_v38 = vpop.permute.xlu1 %604  ;;  %v2526_v57 = vpop.permute.xlu2 %725 }
 0x13a   :  { %v798_v13 = vpop.permute.xlu0 %797 }
 0x141   :  { %v765_v24 = vpop.permute.xlu2 %764  ;;  %v2530_v46 = vpop.permute.xlu1 %824 }
 0x142   :  { %v2528_v37 = vpop.permute.xlu0 %602  ;;  %v835_v25 = vsel %vm832_vm7, %v2530_v46, %v827_v5 }
 0x143   :  { %995 = vrot.lane.b32.xlu0 %v835_v25, %s2115_s9 }
 0x149   :  { %v2536_v1 = vpop.permute.xlu2 %635  ;;  %v2538_v28 = vpop.permute.xlu1 %758 }
 0x14a   :  { %v829_v52 = vpop.permute.xlu0 %828  ;;  %v769_v56 = vsel %vm766_vm9, %v2538_v28, %v761_v10 }
 0x14b   :  { %v836_v54 = vsel %vm832_vm7, %v827_v5, %v829_v52  ;;  %v904_v4 = vsel %vm838_vm10, %v769_v56, %v802_v30  ;;  %v803_v5 = vsel %vm799_vm8, %v2489_v58, %v796_v11  ;;  %v704_v58 = vsel %vm326_vm5, %v2509_v16, %v698_v9 }
 0x14c   :  { %997 = vrot.lane.b32.xlu1 %v836_v54, %s2115_s9  ;;  %983 = vrot.lane.b32.xlu2 %v904_v4, %s2115_s9  ;;  %v804_v4 = vsel %vm799_vm8, %v796_v11, %v798_v13 }
 0x151   :  { %v2551_v22 = vpop.permute.xlu2 %668  ;;  %v831_v25 = vpop.permute.xlu1 %830 }
 0x152   :  { %v763_v44 = vpop.permute.xlu0 %762  ;;  %v837_v43 = vsel %vm832_vm7, %v829_v52, %v831_v25 }
 0x153   :  { %v770_v18 = vsel %vm766_vm9, %v761_v10, %v763_v44  ;;  %v771_v30 = vsel %vm766_vm9, %v763_v44, %v765_v24 }
 0x154   :  { %v907_v54 = vsel %vm838_vm10, %v770_v18, %v803_v5  ;;  %999 = vrot.lane.b32.xlu1 %v837_v43, %s2115_s9  ;;  %v705_v18 = vsel %vm326_vm5, %v698_v9, %v700_v7  ;;  %v910_v24 = vsel %vm838_vm10, %v771_v30, %v804_v4 }
 0x155   :  { %985 = vrot.lane.b32.xlu0 %v907_v54, %s2115_s9 }
 0x159   :  { %v2563_v63 = vpop.permute.xlu2 %789  ;;  %v730_v5 = vpop.permute.xlu1 %729 }
 0x15a   :  { %v728_v56 = vpop.permute.xlu0 %727 }
 0x15b   :  { %v736_v10 = vsel %vm733_vm11, %v2526_v57, %v728_v56  ;;  %v737_v43 = vsel %vm733_vm11, %v728_v56, %v730_v5 }
 0x15c   :  { %v886_v52 = vsel %vm838_vm10, %v704_v58, %v736_v10  ;;  %987 = vrot.lane.b32.xlu1 %v910_v24, %s2115_s9  ;;  %v889_v44 = vsel %vm838_vm10, %v705_v18, %v737_v43 }
 0x15d   :  { %971 = vrot.lane.b32.xlu2 %v886_v52, %s2115_s9  ;;  %973 = vrot.lane.b32.xlu0 %v889_v44, %s2115_s9  ;;  %v568_v44 = vunpack.c.h.b16 %v2381_v60 }
 0x161   :  { %v597_v13 = vpop.permute.xlu2 %596  ;;  %v732_v25 = vpop.permute.xlu1 %731 }
 0x162   :  { %v638_v11 = vpop.permute.xlu0 %637  ;;  %v738_v54 = vsel %vm733_vm11, %v730_v5, %v732_v25  ;;  %v567_v25 = vunpack.c.l.b16 %v2381_v60 }
 0x163   :  { %v892_v58 = vsel %vm838_vm10, %v700_v7, %v738_v54  ;;  %v644_v30 = vsel %vm639_vm12, %v2536_v1, %v638_v11 }
 0x164   :  { %v573_v59 = vpack.c.b16 %v567_v25, %v567_v25 }
 0x165   :  { %975 = vrot.lane.b32.xlu2 %v892_v58, %s2115_s9  ;;  %v574_v58 = vpack.c.b16 %v568_v44, %v568_v44 }
 0x169   :  { %v2580_v10 = vpop.permute.xlu2 %600  ;;  %v788_v4 = vpop.permute.xlu1 %787 }
 0x16a   :  { %v671_v9 = vpop.permute.xlu0 %670 }
 0x16b   :  { %v677_v56 = vsel %vm672_vm13, %v2551_v22, %v671_v9  ;;  %v2585_v7 = vsel %vm838_vm10, %v638_v11, %v671_v9 }
 0x16c   :  { %v871_v52 = vsel %vm838_vm10, %v644_v30, %v677_v56 }
 0x16d   :  { %961 = vrot.lane.b32.xlu1 %v871_v52, %s2115_s9 }
 0x171   :  { %v755_v18 = vpop.permute.xlu2 %754  ;;  %v694_v43 = vpop.permute.xlu1 %693 }
 0x172   :  { %v692_v5 = vpop.permute.xlu0 %691  ;;  %v895_v24 = vsel %vm838_vm10, %v755_v18, %v788_v4 }
 0x175   :  { %977 = vrot.lane.b32.xlu1 %v895_v24, %s2115_s9  ;;  %v569_v24 = vunpack.c.l.b16 %v2383_v32 }
 0x177   :  { %v575_v31 = vpack.c.b16 %v569_v24, %v569_v24 }
 0x179   :  { %v595_v56 = vpop.permute.xlu1 %594  ;;  %v722_v25 = vpop.permute.xlu2 %721 }
 0x17a   :  { %v599_v54 = vpop.permute.xlu0 %598  ;;  %v607_v11 = vsel %vm442_vm6, %v595_v56, %v597_v13  ;;  %v877_v24 = vsel %vm838_vm10, %v692_v5, %v722_v25 }
 0x17b   :  { %v608_v30 = vsel %vm442_vm6, %v597_v13, %v599_v54  ;;  %v841_v9 = vsel %vm838_vm10, %v573_v59, %v607_v11  ;;  %v609_v60 = vsel %vm442_vm6, %v599_v54, %v2580_v10 }
 0x17c   :  { %v844_v52 = vsel %vm838_vm10, %v574_v58, %v608_v30  ;;  %941 = vrot.lane.b32.xlu2 %v841_v9, %s2115_s9  ;;  %v847_v62 = vsel %vm838_vm10, %v575_v31, %v609_v60  ;;  %v702_v31 = vsel %vm326_vm5, %v692_v5, %v694_v43  ;;  %v800_v60 = vsel %vm799_vm8, %v788_v4, %v2563_v63 }
 0x17d   :  { %943 = vrot.lane.b32.xlu0 %v844_v52, %s2115_s9  ;;  %v801_v5 = vsel %vm799_vm8, %v2563_v63, %v2517_v41  ;;  %v703_v63 = vsel %vm326_vm5, %v694_v43, %v2509_v16  ;;  %v570_v16 = vunpack.c.h.b16 %v2383_v32  ;;  %v571_v43 = vunpack.c.l.b16 %v2385_v15 }
 0x181   :  { %v823_v45 = vpop.permute.xlu1 %822  ;;  %v630_v54 = vpop.permute.xlu2 %629 }
 0x182   :  { %v821_v44 = vpop.permute.xlu0 %820  ;;  %v834_v30 = vsel %vm832_vm7, %v823_v45, %v2530_v46 }
 0x183   :  { %v833_v59 = vsel %vm832_vm7, %v821_v44, %v823_v45 }
 0x184   :  { %989 = vrot.lane.b32.xlu2 %v821_v44, %s2115_s9 }
 0x185   :  { %945 = vrot.lane.b32.xlu0 %v847_v62, %s2115_s9 }
 0x189   :  { %v628_v58 = vpop.permute.xlu1 %627 }
 0x18a   :  { %v757_v13 = vpop.permute.xlu0 %756 }
 0x18b   :  { %v767_v62 = vsel %vm766_vm9, %v755_v18, %v757_v13  ;;  %v768_v46 = vsel %vm766_vm9, %v757_v13, %v2538_v28  ;;  %v663_v18 = vpop.permute.xlu2 %662 }
 0x18c   :  { %993 = vrot.lane.b32.xlu2 %v834_v30, %s2115_s9  ;;  %v898_v45 = vsel %vm838_vm10, %v767_v62, %v800_v60  ;;  %v640_v30 = vsel %vm639_vm12, %v628_v58, %v630_v54  ;;  %v576_v60 = vpack.c.b16 %v570_v16, %v570_v16 }
 0x18d   :  { %991 = vrot.lane.b32.xlu0 %v833_v59, %s2115_s9  ;;  %v901_v59 = vsel %vm838_vm10, %v768_v46, %v801_v5 }
 0x191   :  { %v661_v11 = vpop.permute.xlu1 %660 }
 0x192   :  { %v724_v56 = vpop.permute.xlu0 %723 }
 0x193   :  { %v734_v52 = vsel %vm733_vm11, %v722_v25, %v724_v56  ;;  %v673_v25 = vsel %vm672_vm13, %v661_v11, %v663_v18  ;;  %v735_v28 = vsel %vm733_vm11, %v724_v56, %v2526_v57 }
 0x194   :  { %v880_v9 = vsel %vm838_vm10, %v702_v31, %v734_v52  ;;  %979 = vrot.lane.b32.xlu2 %v898_v45, %s2115_s9  ;;  %v859_v31 = vsel %vm838_vm10, %v640_v30, %v673_v25  ;;  %v883_v58 = vsel %vm838_vm10, %v703_v63, %v735_v28  ;;  %v611_v45 = vsel %vm442_vm6, %v2528_v37, %v2524_v38 }
 0x195   :  { %967 = vrot.lane.b32.xlu1 %v880_v9, %s2115_s9  ;;  %965 = vrot.lane.b32.xlu0 %v877_v24, %s2115_s9 }
 0x199   :  { %v634_v4 = vpop.permute.xlu1 %633 }
 0x19a   :  { %v632_v44 = vpop.permute.xlu0 %631  ;;  %v643_v46 = vsel %vm639_vm12, %v634_v4, %v2536_v1 }
 0x19b   :  { %v641_v41 = vsel %vm639_vm12, %v630_v54, %v632_v44  ;;  %v642_v9 = vsel %vm639_vm12, %v632_v44, %v634_v4  ;;  %v610_v54 = vsel %vm442_vm6, %v2580_v10, %v2528_v37  ;;  %v577_v44 = vpack.c.b16 %v571_v43, %v571_v43 }
 0x19c   :  { %953 = vrot.lane.b32.xlu2 %v859_v31, %s2115_s9  ;;  %v850_v32 = vsel %vm838_vm10, %v576_v60, %v610_v54 }
 0x19d   :  { %981 = vrot.lane.b32.xlu1 %v901_v59, %s2115_s9  ;;  %v853_v10 = vsel %vm838_vm10, %v577_v44, %v611_v45 }
 0x1a1   :  { %v667_v52 = vpop.permute.xlu1 %666 }
 0x1a2   :  { %v665_v13 = vpop.permute.xlu0 %664  ;;  %v676_v56 = vsel %vm672_vm13, %v667_v52, %v2551_v22  ;;  %v572_v22 = vunpack.c.h.b16 %v2385_v15 }
 0x1a3   :  { %v674_v62 = vsel %vm672_vm13, %v663_v18, %v665_v13  ;;  %v675_v24 = vsel %vm672_vm13, %v665_v13, %v667_v52  ;;  %v868_v18 = vsel %vm838_vm10, %v643_v46, %v676_v56 }
 0x1a4   :  { %v862_v11 = vsel %vm838_vm10, %v641_v41, %v674_v62  ;;  %v865_v57 = vsel %vm838_vm10, %v642_v9, %v675_v24  ;;  %v578_v5 = vpack.c.b16 %v572_v22, %v572_v22 }
 0x1a5   :  { %969 = vrot.lane.b32.xlu1 %v883_v58, %s2115_s9  ;;  %955 = vrot.lane.b32.xlu0 %v862_v11, %s2115_s9 }
 0x1a6   :  { %957 = vrot.lane.b32.xlu2 %v865_v57, %s2115_s9  ;;  %v856_v37 = vsel %vm838_vm10, %v578_v5, %v2524_v38  ;;  %v984_v4 = vpop.permute.xlu2 %983 }
 0x1ad   :  { %947 = vrot.lane.b32.xlu1 %v850_v32, %s2115_s9  ;;  %959 = vrot.lane.b32.xlu0 %v868_v18, %s2115_s9 }
 0x1ae   :  { %949 = vrot.lane.b32.xlu2 %v853_v10, %s2115_s9 }
 0x1b5   :  { %951 = vrot.lane.b32.xlu1 %v856_v37, %s2115_s9  ;;  %963 = vrot.lane.b32.xlu0 %v2585_v7, %s2115_s9  ;;  %v996_v1 = vpop.permute.xlu0 %995 }
 0x1b7   :  { %v972_v15 = vpop.permute.xlu2 %971 }
 0x1be   :  { %v998_v25 = vpop.permute.xlu1 %997 }
 0x1bf   :  { %v1025_v59 = vsel %vm544_vm2, %v996_v1, %v998_v25  ;;  %v976_v38 = vpop.permute.xlu2 %975 }
 0x1c0   :  { %v1061_v30 = vsel %vm838_vm10, %v1025_v59, 0 }
 0x1c1   :  { %1108 = vmatpush.bf16.msrb.mxu3 %v1061_v30 }
 0x1c6   :  { %v1000_v52 = vpop.permute.xlu1 %999 }
 0x1c7   :  { %v2670_v31 = vpop.permute.xlu0 %985 }
 0x1c8   :  { %v1020_v28 = vsel %vm544_vm2, %v984_v4, %v2670_v31 }
 0x1c9   :  { %1109 = vmatpush.bf16.msrb.mxu3 %v1020_v28  ;;  %v911_v28 = vld [vmem:[%s3042_s5] sm:$0xf] }
 0x1ca   :  { %914 = vperm.xlu2 %1998, %v911_v28  }
 0x1ce   :  { %v988_v24 = vpop.permute.xlu1 %987 }
 0x1cf   :  { %v974_v13 = vpop.permute.xlu0 %973 }
 0x1d0   :  { %v1015_v63 = vsel %vm544_vm2, %v972_v15, %v974_v13  ;;  %v2676_v7 = vsel %vm544_vm2, %v974_v13, %v976_v38 }
 0x1d1   :  { %1110 = vmatpush.bf16.msrb.mxu3 %v1015_v63 }
 0x1d6   :  { %v942_v41 = vpop.permute.xlu2 %941 }
 0x1de   :  { %v990_v62 = vpop.permute.xlu2 %989 }
 0x1df   :  { %v2680_v16 = vpop.permute.xlu1 %961 }
 0x1e6   :  { %v994_v58 = vpop.permute.xlu2 %993 }
 0x1e7   :  { %v1024_v11 = vsel %vm544_vm2, %v994_v58, %v996_v1  ;;  %v978_v54 = vpop.permute.xlu1 %977 }
 0x1e8   :  { %v1058_v9 = vsel %vm838_vm10, %v1024_v11, 0 }
 0x1e9   :  { %1095 = vmatpush.bf16.msrb.mxu2 %v1058_v9 }
 0x1ee   :  { %v980_v18 = vpop.permute.xlu2 %979 }
 0x1ef   :  { %v944_v57 = vpop.permute.xlu0 %943  ;;  %v1017_v44 = vsel %vm544_vm2, %v978_v54, %v980_v18 }
 0x1f0   :  { %v1002_v9 = vsel %vm544_vm2, %v942_v41, %v944_v57 }
 0x1f6   :  { %v954_v1 = vpop.permute.xlu2 %953 }
 0x1f7   :  { %v946_v43 = vpop.permute.xlu0 %945 }
 0x1ff   :  { %v992_v56 = vpop.permute.xlu0 %991 }
 0x200   :  { %v1023_v60 = vsel %vm544_vm2, %v992_v56, %v994_v58  ;;  %v1022_v45 = vsel %vm544_vm2, %v990_v62, %v992_v56  ;;  %v958_v11 = vpop.permute.xlu2 %957 }
 0x201   :  { %v1055_v46 = vsel %vm838_vm10, %v1023_v60, 0  ;;  %v1052_v32 = vsel %vm838_vm10, %v1022_v45, 0  ;;  %v271_v60 = vld [vmem:[%s3041_s4] sm:$0x3] }
 0x202   :  { %1069 = vmatpush.bf16.msra.mxu0 %v1052_v32  ;;  %1082 = vmatpush.bf16.msra.mxu1 %v1055_v46  ;;  %v1021_v46 = vsel %vm544_vm2, %v2670_v31, %v988_v24 }
 0x206   :  { %1070 = vmatpush.bf16.msra.mxu0 %v1017_v44 }
 0x207   :  { %v968_v10 = vpop.permute.xlu1 %967  ;;  %v966_v22 = vpop.permute.xlu0 %965 }
 0x208   :  { %v1012_v5 = vsel %vm544_vm2, %v966_v22, %v968_v10  ;;  %v950_v32 = vpop.permute.xlu2 %949 }
 0x20a   :  { %1071 = vmatpush.bf16.msra.mxu0 %v1012_v5 }
 0x20f   :  { %v982_v37 = vpop.permute.xlu1 %981 }
 0x210   :  { %v1018_v59 = vsel %vm544_vm2, %v980_v18, %v982_v37  ;;  %v1019_v30 = vsel %vm544_vm2, %v982_v37, %v984_v4  ;;  %v1026_v4 = vsel %vm544_vm2, %v998_v25, %v1000_v52  ;;  %v1003_v25 = vsel %vm544_vm2, %v944_v57, %v946_v43 }
 0x211   :  { %1083 = vmatpush.bf16.msra.mxu1 %v1018_v59  ;;  %1096 = vmatpush.bf16.msrb.mxu2 %v1019_v30  ;;  %v1064_v56 = vsel %vm838_vm10, %v1026_v4, 0 }
 0x217   :  { %v970_v38 = vpop.permute.xlu1 %969  ;;  %v956_v13 = vpop.permute.xlu0 %955 }
 0x218   :  { %v1007_v63 = vsel %vm544_vm2, %v954_v1, %v956_v13  ;;  %v1013_v62 = vsel %vm544_vm2, %v968_v10, %v970_v38  ;;  %v1014_v58 = vsel %vm544_vm2, %v970_v38, %v972_v15  ;;  %v1008_v54 = vsel %vm544_vm2, %v956_v13, %v958_v11 }
 0x219   :  { %1072 = vmatpush.bf16.msra.mxu0 %v1007_v63  ;;  %1084 = vmatpush.bf16.msra.mxu1 %v1013_v62 }
 0x21a   :  { %1097 = vmatpush.bf16.msrb.mxu2 %v1014_v58 }
 0x21d   :  { %1073 = vmatpush.bf16.msra.mxu0 %v1002_v9  ;;  %1085 = vmatpush.bf16.msra.mxu1 %v1008_v54 }
 0x21f   :  { %v960_v15 = vpop.permute.xlu0 %959  ;;  %v948_v45 = vpop.permute.xlu1 %947 }
 0x220   :  { %1890 = vmatmul.msk.bf16.vlgmr.msra.gmra.mxu0 %vm1047_vm14, %v271_v60  ;;  %v1009_v41 = vsel %vm544_vm2, %v958_v11, %v960_v15  ;;  %v1010_v52 = vsel %vm544_vm2, %v960_v15, %v2680_v16  ;;  %v1004_v18 = vsel %vm544_vm2, %v946_v43, %v948_v45  ;;  %v1005_v57 = vsel %vm544_vm2, %v948_v45, %v950_v32  ;;  %v80_v43 = vld [vmem:[%s3039_s2] sm:$0xaa]  ;;  %v81_v11 = vld [vmem:[%s3039_s2 + $0x8] sm:$0x2] }
 0x221   :  { %1121 = vmatpush.bf16.msrb.mxu0 %v1064_v56  ;;  %1086 = vmatpush.bf16.msra.mxu1 %v1003_v25  ;;  %v1137_v62 = vunpack.c.h.bf16 %v80_v43  ;;  %v1138_v54 = vunpack.c.l.bf16 %v81_v11 }
 0x222   :  { %1098 = vmatpush.bf16.msrb.mxu2 %v1009_v41  ;;  %1111 = vmatpush.bf16.msrb.mxu3 %v1010_v52 }
 0x223   :  { %v1144_v56 = vperm.slane %v1137_v62, 2  ;;  %v1145_v45 = vperm.slane %v1137_v62, 6  ;;  %v1146_v41 = vperm.slane %v1138_v54, 2 }
 0x224   :  { %1891 = vmatmul.msk.bf16.vlgmr.msra.gmra.mxu1 %vm1047_vm14, %v271_v60  ;;  %v915_v22 = vpop.permute.xlu2 %914 }
 0x225   :  { %1122 = vmatpush.bf16.msrb.mxu0 %v1021_v46  ;;  %v1154_v46 = vperm.slane %v1144_v56, 2 }
 0x226   :  { %1099 = vmatpush.bf16.msrb.mxu2 %v1004_v18  ;;  %1112 = vmatpush.bf16.msrb.mxu3 %v1005_v57  ;;  %v1155_v57 = vperm.slane %v1145_v45, 2 }
 0x227   :  { %v964_v44 = vpop.permute.xlu0 %963  ;;  %v952_v31 = vpop.permute.xlu1 %951 }
 0x228   :  { %v1011_v10 = vsel %vm544_vm2, %v2680_v16, %v964_v44  ;;  %v1006_v24 = vsel %vm544_vm2, %v950_v32, %v952_v31 }
 0x229   :  { %1123 = vmatpush.bf16.msrb.mxu0 %v2676_v7  ;;  %1892 = vmatmul.msk.bf16.vlgmr.msrb.gmra.mxu2 %vm1047_vm14, %v271_v60  ;;  %v1136_v7 = vunpack.c.l.bf16 %v80_v43  ;;  %v1156_v43 = vperm.slane %v1146_v41, 2 }
 0x22a   :  { %1893 = vmatmul.msk.bf16.vlgmr.msrb.gmra.mxu3 %vm1047_vm14, %v271_v60 }
 0x22b   :  { %v1142_v5 = vperm.slane %v1136_v7, 2  ;;  %v1143_v59 = vperm.slane %v1136_v7, 6 }
 0x22d   :  { %1124 = vmatpush.bf16.msrb.mxu0 %v1011_v10  ;;  %v1152_v30 = vperm.slane %v1142_v5, 2  ;;  %v1153_v13 = vperm.slane %v1143_v59, 2 }
 0x231   :  { %1125 = vmatpush.bf16.msrb.mxu0 %v1006_v24 }
 0x234   :  { %1894 = vmatmul.msk.bf16.vlgmr.msrb.gmra.mxu0 %vm1047_vm14, %v271_v60 }
 0x29d   :  { %v1075_v37 = vpop.f32.mrf.mxu0 }
 0x29e   :  { %v1076_v1 = vadd.f32 %v1075_v37, %v915_v22 }
 0x2a0   :  { %v1131_v16 = vmax.f32 %v1076_v1, 0.0 }
 0x2a1   :  { %v1088_v28 = vpop.f32.mrf.mxu1 }
 0x2a2   :  { %v1089_v38 = vadd.f32 %v1088_v28, %v915_v22  ;;  %v1157_v58 = vmul.f32 %v1152_v30, %v1131_v16 }
 0x2a4   :  { %v1132_v63 = vmax.f32 %v1089_v38, 0.0 }
 0x2a5   :  { %v1077_v4 = vpop.f32.mrf.mxu0 }
 0x2a6   :  { %v1158_v9 = vmul.f32 %v1153_v13, %v1132_v63 }
 0x2a8   :  { %v1162_v60 = vpack.c.bf16 %v1158_v9, %v1157_v58 }
 0x2a9   :  { %v1090_v15 = vpop.f32.mrf.mxu1 }
 0x2aa   :  { %1165 = vst [vmem:[#allocation3 + $0x4] sm:$0x33] %v1162_v60 }
 0x2ac   :  { %v1101_v25 = vpop.f32.mrf.mxu2 }
 0x2ad   :  { %v1102_v52 = vadd.f32 %v1101_v25, %v915_v22  ;;  %v1114_v32 = vpop.f32.mrf.mxu3 }
 0x2ae   :  { %v1115_v18 = vadd.f32 %v1114_v32, %v915_v22 }
 0x2af   :  { %v1133_v44 = vmax.f32 %v1102_v52, 0.0 }
 0x2b0   :  { %v1134_v31 = vmax.f32 %v1115_v18, 0.0 }
 0x2b1   :  { %v1127_v10 = vpop.f32.mrf.mxu0  ;;  %v1159_v7 = vmul.f32 %v1154_v46, %v1133_v44  ;;  %v1208_v1 = vld [vmem:[#allocation3 + $0x4] sm:$0xff] }
 0x2b2   :  { %v1128_v24 = vadd.f32 %v1127_v10, %v915_v22  ;;  %v1160_v5 = vmul.f32 %v1155_v57, %v1134_v31  ;;  %v1169_v59 = vld [vmem:[#allocation3] sm:$0xff]  ;;  %v1450_v16 = vunpack.c.h.b16 %v1208_v1  ;;  %v1211_v30 = vunpack.c.l.bf16 %v1208_v1 }
 0x2b3   :  { %v1212_v28 = vunpack.c.h.bf16 %v1208_v1  ;;  %v1358_v38 = vunpack.c.l.b16 %v1208_v1  ;;  %v1262_v62 = vunpack.c.l.b16 %v1169_v59  ;;  %v1263_v25 = vunpack.c.h.b16 %v1169_v59 }
 0x2b4   :  { %v1135_v37 = vmax.f32 %v1128_v24, 0.0  ;;  %v1163_v13 = vpack.c.bf16 %v1160_v5, %v1159_v7  ;;  %v1103_v58 = vpop.f32.mrf.mxu2  ;;  %v1456_v11 = vpack.c.b16 %v1450_v16, %v1450_v16  ;;  %v1235_v9 = vmul.f32 %v2411_v21, %v1211_v30 }
 0x2b5   :  { %v1363_v4 = vpack.c.b16 %v1358_v38, %v1358_v38  ;;  %v1116_v54 = vpop.f32.mrf.mxu3  ;;  %v1268_v56 = vpack.c.b16 %v1262_v62, %v1262_v62  ;;  %v1236_v60 = vmul.f32 %v1212_v28, %v2417_v61  ;;  %v1269_v46 = vpack.c.b16 %v1263_v25, %v1263_v25 }
 0x2b6   :  { %v1161_v63 = vmul.f32 %v1156_v43, %v1135_v37  ;;  %1166 = vst [vmem:[#allocation3 + $0xc] sm:$0x33] %v1163_v13  ;;  %1463 = vrot.lane.b32.xlu1 %v1456_v11, %s2118_s11  ;;  %v1172_v21 = vunpack.c.l.bf16 %v1169_v59  ;;  %v1173_v18 = vunpack.c.h.bf16 %v1169_v59  ;;  %v1226_v44 = vmul.f32 %v2426_v17, %v1211_v30 }
 0x2b7   :  { %1368 = vrot.lane.b32.xlu2 %v1363_v4, %s2111_s25  ;;  %1274 = vrot.lane.b32.xlu0 %v1268_v56, %s2112_s26  ;;  %v1241_v45 = vpack.c.bf16 %v1236_v60, %v1235_v9  ;;  %v1227_v10 = vmul.f32 %v1212_v28, %v2438_v23  ;;  %v1217_v17 = vmul.f32 %v2450_v19, %v1211_v30 }
 0x2b8   :  { %v1164_v22 = vpack.c.bf16 %v1161_v63, %v1161_v63  ;;  %v1178_v31 = vmul.f32 %v2310_v8, %v1172_v21  ;;  %v1179_v24 = vmul.f32 %v1173_v18, %v2328_v26  ;;  %v1218_v23 = vmul.f32 %v1212_v28, %v2464_v6 }
 0x2b9   :  { %v1129_v15 = vpop.f32.mrf.mxu0  ;;  %v1482_v41 = vunpack.c.h.b16 %v1241_v45  ;;  %v1481_v57 = vunpack.c.l.b16 %v1241_v45  ;;  %v1232_v5 = vpack.c.bf16 %v1227_v10, %v1226_v44  ;;  %v1196_v63 = vmul.f32 %v2458_v39, %v1172_v21 }
 0x2ba   :  { %1167 = vst [vmem:[#allocation3 + $0x14] sm:$0x3] %v1164_v22  ;;  %v2738_v37 = vpack.c.bf16 %v1179_v24, %v1178_v31  ;;  %v1223_v38 = vpack.c.bf16 %v1218_v23, %v1217_v17  ;;  %v1197_v62 = vmul.f32 %v1173_v18, %v2470_v20  ;;  %v1187_v25 = vmul.f32 %v2432_v14, %v1172_v21 }
 0x2bb   :  { %v1488_v52 = vpack.c.b16 %v1482_v41, %v1482_v41  ;;  %v1487_v7 = vpack.c.b16 %v1481_v57, %v1481_v57  ;;  %v1418_v59 = vunpack.c.h.b16 %v1232_v5  ;;  %v1417_v8 = vunpack.c.l.b16 %v1232_v5 }
 0x2bc   :  { %v1385_v58 = vunpack.c.l.b16 %v1223_v38  ;;  %v1202_v6 = vpack.c.bf16 %v1197_v62, %v1196_v63  ;;  %v1188_v41 = vmul.f32 %v1173_v18, %v2443_v12 }
 0x2bd   :  { %v1209_v32 = vld [vmem:[#allocation3 + $0xc] sm:$0xff]  ;;  %v1424_v26 = vpack.c.b16 %v1418_v59, %v1418_v59  ;;  %v1423_v13 = vpack.c.b16 %v1417_v8, %v1417_v8 }
 0x2be   :  { %1276 = vrot.lane.b32.xlu1 %v1269_v46, %s2112_s26  ;;  %v1451_v61 = vunpack.c.l.b16 %v1209_v32  ;;  %v1452_v1 = vunpack.c.h.b16 %v1209_v32  ;;  %v2750_v19 = vld [vmem:[#allocation3 + $0x8] sm:$0xff]  ;;  %v1213_v30 = vunpack.c.l.bf16 %v1209_v32  ;;  %v1214_v28 = vunpack.c.h.bf16 %v1209_v32 }
 0x2bf   :  { %1495 = vrot.lane.b32.xlu2 %v1488_v52, %s2119_s12  ;;  %1461 = vrot.lane.b32.xlu0 %v1363_v4, %s2118_s11  ;;  %v1391_v4 = vpack.c.b16 %v1385_v58, %v1385_v58  ;;  %v1174_v22 = vunpack.c.l.bf16 %v2750_v19  ;;  %v1175_v56 = vunpack.c.h.bf16 %v2750_v19  ;;  %v1326_v39 = vunpack.c.l.b16 %v1202_v6 }
 0x2c0   :  { %v1457_v43 = vpack.c.b16 %v1451_v61, %v1451_v61  ;;  %v1458_v16 = vpack.c.b16 %v1452_v1, %v1452_v1  ;;  %v1237_v15 = vmul.f32 %v1213_v30, %v2273_v35  ;;  %v1238_v45 = vmul.f32 %v1214_v28, %v2276_v36 }
 0x2c1   :  { %v2752_v9 = vld [vmem:[#allocation3 + $0x10] sm:$0xff]  ;;  %v1265_v52 = vunpack.c.h.b16 %v2750_v19  ;;  %v1180_v46 = vmul.f32 %v1174_v22, %v2358_v55  ;;  %v1181_v32 = vmul.f32 %v1175_v56, %v2352_v50  ;;  %v1332_v44 = vpack.c.b16 %v1326_v39, %v1326_v39 }
 0x2c2   :  { %v2760_v20 = vunpack.c.l.bf16 %v2752_v9  ;;  %v2763_v60 = vunpack.c.h.bf16 %v2752_v9  ;;  %v1242_v36 = vpack.c.bf16 %v1238_v45, %v1237_v15  ;;  %v1193_v10 = vpack.c.bf16 %v1188_v41, %v1187_v25 }
 0x2c3   :  { %v2772_v61 = vpack.c.bf16 %v1181_v32, %v1180_v46  ;;  %v1271_v14 = vpack.c.b16 %v1265_v52, %v1265_v52  ;;  %v1219_v12 = vmul.f32 %v1213_v30, %v2298_v2  ;;  %v1327_v5 = vunpack.c.h.b16 %v1202_v6 }
 0x2c4   :  { %v1182_v57 = vmul.f32 %v2760_v20, %v2349_v49  ;;  %v1183_v35 = vmul.f32 %v2763_v60, %v2212_v42  ;;  %v1484_v50 = vunpack.c.h.b16 %v1242_v36  ;;  %v1295_v55 = vunpack.c.h.b16 %v1193_v10 }
 0x2c5   :  { %v1220_v49 = vmul.f32 %v1214_v28, %v2301_v3  ;;  %v1294_v18 = vunpack.c.l.b16 %v1193_v10  ;;  %v1483_v1 = vunpack.c.l.b16 %v1242_v36  ;;  %v1228_v59 = vmul.f32 %v1213_v30, %v2256_v29 }
 0x2c6   :  { %1493 = vrot.lane.b32.xlu1 %v1487_v7, %s2119_s12  ;;  %v2778_v21 = vpack.c.bf16 %v1183_v35, %v1182_v57  ;;  %v1490_v42 = vpack.c.b16 %v1484_v50, %v1484_v50  ;;  %v1301_v31 = vpack.c.b16 %v1295_v55, %v1295_v55  ;;  %v1229_v2 = vmul.f32 %v1214_v28, %v2264_v33  ;;  %v1210_v28 = vld [vmem:[#allocation3 + $0x14] sm:$0xff] }
 0x2c7   :  { %1465 = vrot.lane.b32.xlu2 %v1457_v43, %s2118_s11  ;;  %1370 = vrot.lane.b32.xlu0 %v1456_v11, %s2111_s25  ;;  %v1386_v11 = vunpack.c.h.b16 %v1223_v38  ;;  %v1224_v24 = vpack.c.bf16 %v1220_v49, %v1219_v12  ;;  %v1333_v3 = vpack.c.b16 %v1327_v5, %v1327_v5  ;;  %v1489_v23 = vpack.c.b16 %v1483_v1, %v1483_v1  ;;  %v1207_v55 = vld [vmem:[#allocation3 + $0x14] sm:$0xf] }
 0x2c8   :  { %v1233_v8 = vpack.c.bf16 %v1229_v2, %v1228_v59  ;;  %v1189_v38 = vmul.f32 %v1174_v22, %v2482_v40  ;;  %v1199_v6 = vmul.f32 %v1175_v56, %v2502_v27  ;;  %v1215_v39 = vunpack.c.l.bf16 %v1210_v28  ;;  %v3058_v49 = vld [vmem:[#allocation17_spill] sm:$0xff] }
 0x2c9   :  { %v1392_v54 = vpack.c.b16 %v1386_v11, %v1386_v11  ;;  %v1387_v7 = vunpack.c.l.b16 %v1224_v24  ;;  %v1198_v11 = vmul.f32 %v1174_v22, %v2505_v51  ;;  %v1216_v15 = vunpack.c.h.bf16 %v1210_v28 }
 0x2ca   :  { %v1420_v29 = vunpack.c.h.b16 %v1233_v8  ;;  %v1419_v30 = vunpack.c.l.b16 %v1233_v8  ;;  %v1267_v51 = vunpack.c.h.b16 %v2752_v9  ;;  %v1239_v27 = vmul.f32 %v1215_v39, %v2268_v34 }
 0x2cb   :  { %v1393_v17 = vpack.c.b16 %v1387_v7, %v1387_v7  ;;  %v1240_v22 = vmul.f32 %v1216_v15, %v2223_v53  ;;  %v1454_v57 = vunpack.c.h.b16 %v1210_v28  ;;  %v1222_v36 = vmul.f32 %v1216_v15, %v2221_v47  ;;  %v3059_v47 = vld [vmem:[#allocation15_spill] sm:$0xff]  ;;  %v3061_v7 = vld [vmem:[#allocation16_spill] sm:$0xff] }
 0x2cc   :  { %v1426_v58 = vpack.c.b16 %v1420_v29, %v1420_v29  ;;  %v1273_v52 = vpack.c.b16 %v1267_v51, %v1267_v51  ;;  %v1453_v34 = vunpack.c.l.b16 %v1210_v28  ;;  %v1266_v12 = vunpack.c.l.b16 %v2752_v9 }
 0x2cd   :  { %v1243_v46 = vpack.c.bf16 %v1240_v22, %v1239_v27  ;;  %v1460_v10 = vpack.c.b16 %v1454_v57, %v1454_v57  ;;  %v1192_v5 = vmul.f32 %v2763_v60, %v3061_v7  ;;  %v1362_v1 = vunpack.c.l.b16 %v1207_v55 }
 0x2ce   :  { %1431 = vrot.lane.b32.xlu1 %v1424_v26, %s2120_s13  ;;  %v1264_v26 = vunpack.c.l.b16 %v2750_v19  ;;  %v1459_v50 = vpack.c.b16 %v1453_v34, %v1453_v34  ;;  %v1272_v59 = vpack.c.b16 %v1266_v12, %v1266_v12  ;;  %v1249_v7 = vunpack.c.l.b16 %v2772_v61 }
 0x2cf   :  { %1467 = vrot.lane.b32.xlu2 %v1458_v16, %s2118_s11  ;;  %1429 = vrot.lane.b32.xlu0 %v1423_v13, %s2120_s13  ;;  %v1190_v13 = vmul.f32 %v1175_v56, %v2487_v0  ;;  %v1203_v0 = vpack.c.bf16 %v1199_v6, %v1198_v11  ;;  %v1485_v35 = vunpack.c.l.b16 %v1243_v46 }
 0x2d0   :  { %v1270_v33 = vpack.c.b16 %v1264_v26, %v1264_v26  ;;  %v3062_v26 = vld [vmem:[#allocation19_spill] sm:$0xff] }
 0x2d1   :  { %v1194_v62 = vpack.c.bf16 %v1190_v13, %v1189_v38  ;;  %v1329_v25 = vunpack.c.h.b16 %v1203_v0  ;;  %v1328_v56 = vunpack.c.l.b16 %v1203_v0  ;;  %v1491_v53 = vpack.c.b16 %v1485_v35, %v1485_v35  ;;  %v3063_v13 = vld [vmem:[#allocation14_spill] sm:$0xff] }
 0x2d2   :  { %v1200_v38 = vmul.f32 %v2760_v20, %v3062_v26  ;;  %v1201_v29 = vmul.f32 %v2763_v60, %v3063_v13 }
 0x2d3   :  { %v1297_v19 = vunpack.c.h.b16 %v1194_v62  ;;  %v1296_v40 = vunpack.c.l.b16 %v1194_v62  ;;  %v1335_v41 = vpack.c.b16 %v1329_v25, %v1329_v25  ;;  %v1334_v32 = vpack.c.b16 %v1328_v56, %v1328_v56 }
 0x2d5   :  { %v1302_v45 = vpack.c.b16 %v1296_v40, %v1296_v40 }
 0x2d6   :  { %1372 = vrot.lane.b32.xlu1 %v1457_v43, %s2111_s25  ;;  %v1300_v43 = vpack.c.b16 %v1294_v18, %v1294_v18  ;;  %v1230_v18 = vmul.f32 %v1215_v39, %v3058_v49 }
 0x2d7   :  { %1397 = vrot.lane.b32.xlu2 %v1391_v4, %s2121_s14  ;;  %1399 = vrot.lane.b32.xlu0 %v1392_v54, %s2121_s14  ;;  %v1303_v4 = vpack.c.b16 %v1297_v19, %v1297_v19  ;;  %v1425_v54 = vpack.c.b16 %v1419_v30, %v1419_v30  ;;  %v1486_v19 = vunpack.c.h.b16 %v1243_v46 }
 0x2de   :  { %1338 = vrot.lane.b32.xlu1 %v1332_v44, %s2123_s16  ;;  %v1221_v44 = vmul.f32 %v1215_v39, %v2345_v48 }
 0x2df   :  { %1374 = vrot.lane.b32.xlu2 %v1458_v16, %s2111_s25  ;;  %1280 = vrot.lane.b32.xlu0 %v1271_v14, %s2112_s26  ;;  %v1388_v16 = vunpack.c.h.b16 %v1224_v24  ;;  %v3060_v24 = vld [vmem:[#allocation18_spill] sm:$0xff] }
 0x2e0   :  { %v1225_v14 = vpack.c.bf16 %v1222_v36, %v1221_v44 }
 0x2e1   :  { %v1394_v63 = vpack.c.b16 %v1388_v16, %v1388_v16 }
 0x2e2   :  { %v1389_v48 = vunpack.c.l.b16 %v1225_v14 }
 0x2e4   :  { %v1395_v2 = vpack.c.b16 %v1389_v48, %v1389_v48 }
 0x2e6   :  { %1499 = vrot.lane.b32.xlu1 %v1490_v42, %s2119_s12 }
 0x2e7   :  { %1308 = vrot.lane.b32.xlu2 %v1301_v31, %s2122_s15  ;;  %1306 = vrot.lane.b32.xlu0 %v1300_v43, %s2122_s15  ;;  %v1231_v31 = vmul.f32 %v1216_v15, %v3059_v47  ;;  %v1191_v43 = vmul.f32 %v2760_v20, %v3060_v24  ;;  %v1492_v20 = vpack.c.b16 %v1486_v19, %v1486_v19 }
 0x2ee   :  { %1401 = vrot.lane.b32.xlu1 %v1393_v17, %s2121_s14  ;;  %v1234_v17 = vpack.c.bf16 %v1231_v31, %v1230_v18 }
 0x2ef   :  { %1340 = vrot.lane.b32.xlu2 %v1333_v3, %s2123_s16  ;;  %1497 = vrot.lane.b32.xlu0 %v1489_v23, %s2119_s12  ;;  %v1195_v3 = vpack.c.bf16 %v1192_v5, %v1191_v43  ;;  %v1367_v23 = vpack.c.b16 %v1362_v1, %v1362_v1  ;;  %v1248_v43 = vunpack.c.h.b16 %v2738_v37 }
 0x2f0   :  { %v1421_v8 = vunpack.c.l.b16 %v1234_v17 }
 0x2f1   :  { %v1298_v16 = vunpack.c.l.b16 %v1195_v3  ;;  %v1299_v40 = vunpack.c.h.b16 %v1195_v3 }
 0x2f3   :  { %v1304_v62 = vpack.c.b16 %v1298_v16, %v1298_v16  ;;  %v1305_v0 = vpack.c.b16 %v1299_v40, %v1299_v40 }
 0x2f6   :  { %1403 = vrot.lane.b32.xlu1 %v1394_v63, %s2121_s14  ;;  %v1422_v63 = vunpack.c.h.b16 %v1234_v17 }
 0x2f7   :  { %1278 = vrot.lane.b32.xlu2 %v1270_v33, %s2112_s26  ;;  %1435 = vrot.lane.b32.xlu0 %v1426_v58, %s2120_s13  ;;  %v1427_v33 = vpack.c.b16 %v1421_v8, %v1421_v8  ;;  %v1204_v58 = vpack.c.bf16 %v1201_v29, %v1200_v38  ;;  %v1255_v8 = vpack.c.b16 %v1249_v7, %v1249_v7 }
 0x2f8   :  { %v1428_v11 = vpack.c.b16 %v1422_v63, %v1422_v63  ;;  %v1252_v63 = vunpack.c.h.b16 %v2778_v21 }
 0x2f9   :  { %v1331_v30 = vunpack.c.h.b16 %v1204_v58 }
 0x2fb   :  { %v1337_v28 = vpack.c.b16 %v1331_v30, %v1331_v30 }
 0x2fe   :  { %1312 = vrot.lane.b32.xlu1 %v1303_v4, %s2122_s15 }
 0x2ff   :  { %1433 = vrot.lane.b32.xlu2 %v1425_v54, %s2120_s13  ;;  %1310 = vrot.lane.b32.xlu0 %v1302_v45, %s2122_s15  ;;  %v1330_v54 = vunpack.c.l.b16 %v1204_v58  ;;  %v1390_v45 = vunpack.c.h.b16 %v1225_v14 }
 0x301   :  { %v1336_v25 = vpack.c.b16 %v1330_v54, %v1330_v54  ;;  %v1396_v51 = vpack.c.b16 %v1390_v45, %v1390_v45 }
 0x306   :  { %1344 = vrot.lane.b32.xlu1 %v1335_v41, %s2123_s16 }
 0x307   :  { %1284 = vrot.lane.b32.xlu2 %v1273_v52, %s2112_s26  ;;  %1342 = vrot.lane.b32.xlu0 %v1334_v32, %s2123_s16  ;;  %v1247_v52 = vunpack.c.l.b16 %v2738_v37 }
 0x309   :  { %v1253_v57 = vpack.c.b16 %v1247_v52, %v1247_v52 }
 0x30e   :  { %1471 = vrot.lane.b32.xlu1 %v1460_v10, %s2118_s11 }
 0x30f   :  { %1501 = vrot.lane.b32.xlu2 %v1491_v53, %s2119_s12  ;;  %1469 = vrot.lane.b32.xlu0 %v1459_v50, %s2118_s11 }
 0x311   :  { %v2817_v42 = vpop.permute.xlu2 %1368 }
 0x316   :  { %1282 = vrot.lane.b32.xlu1 %v1272_v59, %s2112_s26 }
 0x317   :  { %1405 = vrot.lane.b32.xlu2 %v1395_v2, %s2121_s14  ;;  %1376 = vrot.lane.b32.xlu0 %v1367_v23, %s2111_s25  ;;  %v1254_v2 = vpack.c.b16 %v1248_v43, %v1248_v43 }
 0x319   :  { %v2827_v9 = vpop.permute.xlu2 %1495 }
 0x31e   :  { %1437 = vrot.lane.b32.xlu1 %v1427_v33, %s2120_s13  ;;  %v1258_v33 = vpack.c.b16 %v1252_v63, %v1252_v63 }
 0x31f   :  { %1314 = vrot.lane.b32.xlu2 %v1304_v62, %s2122_s15  ;;  %1439 = vrot.lane.b32.xlu0 %v1428_v11, %s2120_s13 }
 0x321   :  { %v2836_v6 = vpop.permute.xlu2 %1465 }
 0x326   :  { %1503 = vrot.lane.b32.xlu1 %v1492_v20, %s2119_s12 }
 0x327   :  { %1348 = vrot.lane.b32.xlu2 %v1337_v28, %s2123_s16  ;;  %1316 = vrot.lane.b32.xlu0 %v1305_v0, %s2122_s15 }
 0x328   :  { %v1464_v60 = vpop.permute.xlu1 %1463 }
 0x329   :  { %v2841_v4 = vpop.permute.xlu2 %1467  ;;  %v2845_v39 = vsel %vm799_vm8, %v1464_v60, %v2836_v6  ;;  %v1275_v15 = vpop.permute.xlu0 %1274 }
 0x32a   :  { %v1475_v54 = vsel %vm799_vm8, %v2836_v6, %v2841_v4 }
 0x32e   :  { %1346 = vrot.lane.b32.xlu1 %v1336_v25, %s2123_s16 }
 0x32f   :  { %1407 = vrot.lane.b32.xlu0 %v1396_v51, %s2121_s14 }
 0x330   :  { %v1277_v22 = vpop.permute.xlu1 %1276 }
 0x331   :  { %v1398_v27 = vpop.permute.xlu2 %1397  ;;  %v1286_v56 = vsel %vm442_vm6, %v1275_v15, %v1277_v22  ;;  %v1462_v41 = vpop.permute.xlu0 %1461 }
 0x332   :  { %v2857_v44 = vsel %vm838_vm10, %v1253_v57, %v1286_v56  ;;  %v1473_v14 = vsel %vm799_vm8, %v1462_v41, %v1464_v60  ;;  %v1548_v5 = vsel %vm838_vm10, %v2817_v42, %v1398_v27 }
 0x338   :  { %v1494_v32 = vpop.permute.xlu1 %1493 }
 0x339   :  { %v2851_v46 = vpop.permute.xlu2 %1374  ;;  %v2853_v35 = vpop.permute.xlu0 %1370  ;;  %1654 = vrot.lane.b32.xlu2 %v1494_v32, %s2115_s9  ;;  %v1505_v10 = vsel %vm832_vm7, %v1494_v32, %v2827_v9 }
 0x33a   :  { %v1378_v47 = vsel %vm326_vm5, %v2817_v42, %v2853_v35 }
 0x340   :  { %v1432_v36 = vpop.permute.xlu1 %1431 }
 0x341   :  { %v2859_v34 = vpop.permute.xlu2 %1308  ;;  %v1430_v53 = vpop.permute.xlu0 %1429  ;;  %1656 = vrot.lane.b32.xlu2 %v1505_v10, %s2115_s9 }
 0x342   :  { %v1441_v50 = vsel %vm766_vm9, %v1430_v53, %v1432_v36  ;;  %v1566_v12 = vsel %vm838_vm10, %v1430_v53, %v1462_v41 }
 0x343   :  { %v1569_v55 = vsel %vm838_vm10, %v1441_v50, %v1473_v14 }
 0x344   :  { %1644 = vrot.lane.b32.xlu0 %v1569_v55, %s2115_s9 }
 0x348   :  { %v1373_v49 = vpop.permute.xlu1 %1372 }
 0x349   :  { %v2869_v18 = vpop.permute.xlu2 %1340  ;;  %v1400_v48 = vpop.permute.xlu0 %1399  ;;  %1642 = vrot.lane.b32.xlu2 %v1566_v12, %s2115_s9  ;;  %v1379_v6 = vsel %vm326_vm5, %v2853_v35, %v1373_v49  ;;  %v1380_v41 = vsel %vm326_vm5, %v1373_v49, %v2851_v46 }
 0x34a   :  { %v1409_v31 = vsel %vm733_vm11, %v1398_v27, %v1400_v48 }
 0x34b   :  { %v1551_v24 = vsel %vm838_vm10, %v1378_v47, %v1409_v31  ;;  %v1250_v47 = vunpack.c.h.b16 %v2772_v61 }
 0x34c   :  { %1632 = vrot.lane.b32.xlu0 %v1551_v24, %s2115_s9 }
 0x34d   :  { %v1256_v31 = vpack.c.b16 %v1250_v47, %v1250_v47 }
 0x350   :  { %v1339_v1 = vpop.permute.xlu1 %1338 }
 0x351   :  { %v1279_v59 = vpop.permute.xlu2 %1278  ;;  %v2882_v17 = vpop.permute.xlu0 %1280  ;;  %v1350_v3 = vsel %vm672_vm13, %v1339_v1, %v2869_v18  ;;  %1630 = vrot.lane.b32.xlu2 %v1548_v5, %s2115_s9 }
 0x352   :  { %v1287_v23 = vsel %vm442_vm6, %v1277_v22, %v1279_v59  ;;  %v1288_v37 = vsel %vm442_vm6, %v1279_v59, %v2882_v17 }
 0x353   :  { %v1515_v16 = vsel %vm838_vm10, %v1254_v2, %v1287_v23  ;;  %v1518_v42 = vsel %vm838_vm10, %v1255_v8, %v1288_v37 }
 0x354   :  { %1610 = vrot.lane.b32.xlu1 %v1518_v42, %s2115_s9  ;;  %1608 = vrot.lane.b32.xlu0 %v1515_v16, %s2115_s9 }
 0x358   :  { %v1500_v26 = vpop.permute.xlu1 %1499 }
 0x359   :  { %v1434_v38 = vpop.permute.xlu2 %1433  ;;  %v1307_v13 = vpop.permute.xlu0 %1306 }
 0x35a   :  { %v1318_v29 = vsel %vm639_vm12, %v1307_v13, %v2859_v34  ;;  %v1442_v28 = vsel %vm766_vm9, %v1432_v36, %v1434_v38 }
 0x35b   :  { %v2907_v20 = vsel %vm838_vm10, %v1318_v29, %v1350_v3 }
 0x360   :  { %v1402_v62 = vpop.permute.xlu1 %1401 }
 0x361   :  { %v2897_v58 = vpop.permute.xlu2 %1284  ;;  %v1498_v19 = vpop.permute.xlu0 %1497  ;;  %v1410_v51 = vsel %vm733_vm11, %v1400_v48, %v1402_v62 }
 0x362   :  { %v2901_v11 = vsel %vm838_vm10, %v1258_v33, %v2897_v58  ;;  %v1506_v30 = vsel %vm832_vm7, %v2827_v9, %v1498_v19  ;;  %v1507_v40 = vsel %vm832_vm7, %v1498_v19, %v1500_v26  ;;  %v1572_v9 = vsel %vm838_vm10, %v1442_v28, %v2845_v39 }
 0x363   :  { %1660 = vrot.lane.b32.xlu1 %v1507_v40, %s2115_s9  ;;  %1658 = vrot.lane.b32.xlu0 %v1506_v30, %s2115_s9  ;;  %v1554_v39 = vsel %vm838_vm10, %v1379_v6, %v1410_v51 }
 0x368   :  { %v1404_v0 = vpop.permute.xlu1 %1403 }
 0x369   :  { %v1436_v60 = vpop.permute.xlu0 %1435  ;;  %v1502_v25 = vpop.permute.xlu2 %1501  ;;  %v1411_v27 = vsel %vm733_vm11, %v1402_v62, %v1404_v0 }
 0x36a   :  { %v1443_v15 = vsel %vm766_vm9, %v1434_v38, %v1436_v60  ;;  %v1557_v52 = vsel %vm838_vm10, %v1380_v41, %v1411_v27  ;;  %v1508_v50 = vsel %vm832_vm7, %v1500_v26, %v1502_v25 }
 0x36b   :  { %1646 = vrot.lane.b32.xlu1 %v1572_v9, %s2115_s9  ;;  %v1575_v45 = vsel %vm838_vm10, %v1443_v15, %v1475_v54  ;;  %v1251_v54 = vunpack.c.l.b16 %v2778_v21  ;;  %v1769_v21 = vld [vmem:[%s3044_s7] sm:$0xf] }
 0x36c   :  { %1648 = vrot.lane.b32.xlu2 %v1575_v45, %s2115_s9 }
 0x36d   :  { %v1257_v45 = vpack.c.b16 %v1251_v54, %v1251_v54 }
 0x370   :  { %v1313_v22 = vpop.permute.xlu1 %1312 }
 0x371   :  { %v1311_v56 = vpop.permute.xlu0 %1310  ;;  %v1406_v32 = vpop.permute.xlu2 %1405 }
 0x372   :  { %v1319_v10 = vsel %vm639_vm12, %v2859_v34, %v1311_v56  ;;  %v1320_v35 = vsel %vm639_vm12, %v1311_v56, %v1313_v22  ;;  %v1412_v37 = vsel %vm733_vm11, %v1404_v0, %v1406_v32 }
 0x373   :  { %1634 = vrot.lane.b32.xlu1 %v1554_v39, %s2115_s9 }
 0x374   :  { %1636 = vrot.lane.b32.xlu2 %v1557_v52, %s2115_s9 }
 0x378   :  { %v1345_v57 = vpop.permute.xlu1 %1344 }
 0x379   :  { %v1343_v36 = vpop.permute.xlu0 %1342  ;;  %v1315_v49 = vpop.permute.xlu2 %1314 }
 0x37a   :  { %v1351_v53 = vsel %vm672_vm13, %v2869_v18, %v1343_v36  ;;  %v1352_v14 = vsel %vm672_vm13, %v1343_v36, %v1345_v57 }
 0x37b   :  { %v1536_v55 = vsel %vm838_vm10, %v1320_v35, %v1352_v14  ;;  %v1533_v12 = vsel %vm838_vm10, %v1319_v10, %v1351_v53 }
 0x37c   :  { %1662 = vrot.lane.b32.xlu2 %v1508_v50, %s2115_s9  ;;  %1622 = vrot.lane.b32.xlu1 %v1536_v55, %s2115_s9 }
 0x37d   :  { %1620 = vrot.lane.b32.xlu0 %v1533_v12, %s2115_s9 }
 0x380   :  { %v1472_v34 = vpop.permute.xlu1 %1471 }
 0x381   :  { %v1470_v48 = vpop.permute.xlu0 %1469  ;;  %v1349_v5 = vpop.permute.xlu2 %1348 }
 0x382   :  { %v1476_v59 = vsel %vm799_vm8, %v2841_v4, %v1470_v48  ;;  %v1477_v63 = vsel %vm799_vm8, %v1470_v48, %v1472_v34 }
 0x388   :  { %v1283_v18 = vpop.permute.xlu1 %1282 }
 0x389   :  { %v1289_v24 = vsel %vm442_vm6, %v2882_v17, %v1283_v18  ;;  %v1377_v43 = vpop.permute.xlu0 %1376  ;;  %v1290_v9 = vsel %vm442_vm6, %v1283_v18, %v2897_v58 }
 0x38a   :  { %v1521_v7 = vsel %vm838_vm10, %v1256_v31, %v1289_v24  ;;  %v1381_v17 = vsel %vm326_vm5, %v2851_v46, %v1377_v43  ;;  %v1321_v46 = vsel %vm639_vm12, %v1313_v22, %v1315_v49  ;;  %v1524_v51 = vsel %vm838_vm10, %v1257_v45, %v1290_v9  ;;  %v1168_v24 = vld [vmem:[%s3043_s6] sm:$0x3] }
 0x38b   :  { %1612 = vrot.lane.b32.xlu2 %v1521_v7, %s2115_s9  ;;  %v1560_v4 = vsel %vm838_vm10, %v1381_v17, %v1412_v37 }
 0x390   :  { %v1438_v1 = vpop.permute.xlu1 %1437 }
 0x391   :  { %v1444_v2 = vsel %vm766_vm9, %v1436_v60, %v1438_v1  ;;  %v1440_v3 = vpop.permute.xlu0 %1439 }
 0x392   :  { %v1578_v61 = vsel %vm838_vm10, %v1444_v2, %v1476_v59  ;;  %v1445_v29 = vsel %vm766_vm9, %v1438_v1, %v1440_v3 }
 0x393   :  { %v1655_v23 = vpop.permute.xlu2 %1654  ;;  %1650 = vrot.lane.b32.xlu0 %v1578_v61, %s2115_s9  ;;  %v1581_v40 = vsel %vm838_vm10, %v1445_v29, %v1477_v63 }
 0x398   :  { %v1504_v8 = vpop.permute.xlu1 %1503 }
 0x399   :  { %v1509_v16 = vsel %vm832_vm7, %v1502_v25, %v1504_v8  ;;  %v1317_v42 = vpop.permute.xlu0 %1316  ;;  %v1785_v8 = vld [vmem:[%s3044_s7] sm:$0xf]  ;;  %s2124_s7 = smov [#allocation10]  }
 0x39a   :  { %1664 = vrot.lane.b32.xlu1 %v1509_v16, %s2115_s9  ;;  %v1322_v62 = vsel %vm639_vm12, %v1315_v49, %v1317_v42  ;;  %v1545_v27 = vsel %vm838_vm10, %v1317_v42, %v1349_v5  ;;  %s1806_s26 = sshll.u32 %s2124_s7, 4  ;;  %s1807_s26 = int_to_ptr.vmem [resolvable:$true] %s1806_s26 }
 0x39b   :  { %v1657_v26 = vpop.permute.xlu2 %1656  ;;  %1638 = vrot.lane.b32.xlu0 %v1560_v4, %s2115_s9 }
 0x39c   :  { %v1682_v38 = vsel %vm544_vm2, %v1655_v23, %v1657_v26 }
 0x39d   :  { %v1706_v13 = vsel %vm838_vm10, %v1682_v38, 0 }
 0x39e   :  { %1720 = vmatpush.bf16.msrb.mxu1 %v1706_v13 }
 0x3a0   :  { %v1347_v33 = vpop.permute.xlu1 %1346 }
 0x3a1   :  { %v1353_v19 = vsel %vm672_vm13, %v1345_v57, %v1347_v33  ;;  %v1354_v30 = vsel %vm672_vm13, %v1347_v33, %v1349_v5  ;;  %v1408_v60 = vpop.permute.xlu0 %1407 }
 0x3a2   :  { %1652 = vrot.lane.b32.xlu1 %v1581_v40, %s2115_s9  ;;  %v1539_v28 = vsel %vm838_vm10, %v1321_v46, %v1353_v19  ;;  %v1542_v0 = vsel %vm838_vm10, %v1322_v62, %v1354_v30  ;;  %v1413_v15 = vsel %vm733_vm11, %v1406_v32, %v1408_v60 }
 0x3a3   :  { %1624 = vrot.lane.b32.xlu2 %v1539_v28, %s2115_s9  ;;  %1626 = vrot.lane.b32.xlu0 %v1542_v0, %s2115_s9  ;;  %v1563_v25 = vsel %vm838_vm10, %v1377_v43, %v1413_v15  ;;  %v1643_v58 = vpop.permute.xlu2 %1642 }
 0x3aa   :  { %1640 = vrot.lane.b32.xlu1 %v1563_v25, %s2115_s9 }
 0x3ab   :  { %1618 = vrot.lane.b32.xlu2 %v2907_v20, %s2115_s9  ;;  %1614 = vrot.lane.b32.xlu0 %v1524_v51, %s2115_s9  ;;  %v1631_v20 = vpop.permute.xlu2 %1630 }
 0x3b2   :  { %1628 = vrot.lane.b32.xlu1 %v1545_v27, %s2115_s9 }
 0x3b3   :  { %1772 = vperm.xlu2 %1998, %v1769_v21   ;;  %1616 = vrot.lane.b32.xlu0 %v2901_v11, %s2115_s9 }
 0x3b6   :  { %v1645_v22 = vpop.permute.xlu0 %1644 }
 0x3b7   :  { %v1678_v6 = vsel %vm544_vm2, %v1643_v58, %v1645_v22 }
 0x3b8   :  { %1721 = vmatpush.bf16.msrb.mxu1 %v1678_v6 }
 0x3ba   :  { %1606 = vrot.lane.b32.xlu1 %v2857_v44, %s2115_s9 }
 0x3bb   :  { %1788 = vperm.xlu0 %1999, %v1785_v8  }
 0x3be   :  { %v1633_v56 = vpop.permute.xlu0 %1632 }
 0x3bf   :  { %v1674_v41 = vsel %vm544_vm2, %v1631_v20, %v1633_v56 }
 0x3c0   :  { %1722 = vmatpush.bf16.msrb.mxu1 %v1674_v41 }
 0x3c6   :  { %v1649_v39 = vpop.permute.xlu2 %1648  ;;  %v1611_v52 = vpop.permute.xlu1 %1610 }
 0x3c7   :  { %v2995_v32 = vpop.permute.xlu0 %1608 }
 0x3c8   :  { %v1667_v18 = vsel %vm544_vm2, %v2995_v32, %v1611_v52 }
 0x3ce   :  { %v1637_v57 = vpop.permute.xlu2 %1636 }
 0x3d5   :  { %v1661_v36 = vpop.permute.xlu1 %1660  ;;  %v1659_v11 = vpop.permute.xlu0 %1658 }
 0x3d6   :  { %v1683_v10 = vsel %vm544_vm2, %v1657_v26, %v1659_v11  ;;  %v1663_v35 = vpop.permute.xlu2 %1662 }
 0x3d7   :  { %v1709_v53 = vsel %vm838_vm10, %v1683_v10, 0  ;;  %v1684_v14 = vsel %vm544_vm2, %v1661_v36, %v1663_v35 }
 0x3d8   :  { %v1712_v44 = vsel %vm838_vm10, %v1684_v14, 0  ;;  %1733 = vmatpush.bf16.msra.mxu2 %v1709_v53 }
 0x3d9   :  { %1746 = vmatpush.bf16.msra.mxu3 %v1712_v44 }
 0x3dd   :  { %v1647_v50 = vpop.permute.xlu1 %1646 }
 0x3de   :  { %v1679_v55 = vsel %vm544_vm2, %v1645_v22, %v1647_v50 }
 0x3df   :  { %1734 = vmatpush.bf16.msra.mxu2 %v1679_v55 }
 0x3e5   :  { %v1635_v12 = vpop.permute.xlu1 %1634  ;;  %v1613_v31 = vpop.permute.xlu2 %1612 }
 0x3e6   :  { %v1675_v34 = vsel %vm544_vm2, %v1633_v56, %v1635_v12 }
 0x3e7   :  { %1735 = vmatpush.bf16.msra.mxu2 %v1675_v34 }
 0x3ee   :  { %v1623_v49 = vpop.permute.xlu1 %1622 }
 0x3ef   :  { %v1621_v48 = vpop.permute.xlu0 %1620 }
 0x3f0   :  { %v1671_v47 = vsel %vm544_vm2, %v1621_v48, %v1623_v49 }
 0x3f1   :  { %1736 = vmatpush.bf16.msra.mxu2 %v1671_v47 }
 0x3f5   :  { %1737 = vmatpush.bf16.msra.mxu2 %v1667_v18 }
 0x3f8   :  { %1896 = vmatmul.msk.bf16.vlgmr.msra.gmra.mxu2 %vm1047_vm14, %v1168_v24 }
 0x3fd   :  { %v1625_v43 = vpop.permute.xlu2 %1624 }
 0x405   :  { %v1619_v7 = vpop.permute.xlu2 %1618  ;;  %v1651_v5 = vpop.permute.xlu0 %1650 }
 0x406   :  { %v1670_v1 = vsel %vm544_vm2, %v1619_v7, %v1621_v48  ;;  %v1680_v59 = vsel %vm544_vm2, %v1649_v39, %v1651_v5 }
 0x407   :  { %1723 = vmatpush.bf16.msrb.mxu1 %v1670_v1  ;;  %1747 = vmatpush.bf16.msra.mxu3 %v1680_v59 }
 0x40c   :  { %v1665_v2 = vpop.permute.xlu1 %1664 }
 0x40d   :  { %v1685_v3 = vsel %vm544_vm2, %v1663_v35, %v1665_v2  ;;  %v1639_v61 = vpop.permute.xlu0 %1638  ;;  %v1773_v60 = vpop.permute.xlu2 %1772 }
 0x40e   :  { %v1715_v23 = vsel %vm838_vm10, %v1685_v3, 0  ;;  %v1676_v17 = vsel %vm544_vm2, %v1637_v57, %v1639_v61 }
 0x40f   :  { %1748 = vmatpush.bf16.msra.mxu3 %v1676_v17  ;;  %1759 = vmatpush.bf16.msra.mxu0 %v1715_v23 }
 0x414   :  { %v1653_v37 = vpop.permute.xlu1 %1652 }
 0x415   :  { %v1627_v16 = vpop.permute.xlu0 %1626  ;;  %v1681_v42 = vsel %vm544_vm2, %v1651_v5, %v1653_v37 }
 0x416   :  { %1760 = vmatpush.bf16.msra.mxu0 %v1681_v42  ;;  %v1672_v4 = vsel %vm544_vm2, %v1625_v43, %v1627_v16 }
 0x417   :  { %1749 = vmatpush.bf16.msra.mxu3 %v1672_v4 }
 0x41c   :  { %v1641_v26 = vpop.permute.xlu1 %1640 }
 0x41d   :  { %v1615_v38 = vpop.permute.xlu0 %1614  ;;  %v1677_v13 = vsel %vm544_vm2, %v1639_v61, %v1641_v26 }
 0x41e   :  { %1761 = vmatpush.bf16.msra.mxu0 %v1677_v13  ;;  %v1668_v29 = vsel %vm544_vm2, %v1613_v31, %v1615_v38 }
 0x41f   :  { %1750 = vmatpush.bf16.msra.mxu3 %v1668_v29 }
 0x422   :  { %1897 = vmatmul.msk.bf16.vlgmr.msra.gmra.mxu3 %vm1047_vm14, %v1168_v24 }
 0x424   :  { %v1629_v46 = vpop.permute.xlu1 %1628 }
 0x425   :  { %v1673_v63 = vsel %vm544_vm2, %v1627_v16, %v1629_v46  ;;  %v1617_v33 = vpop.permute.xlu0 %1616 }
 0x426   :  { %1762 = vmatpush.bf16.msra.mxu0 %v1673_v63  ;;  %v1669_v62 = vsel %vm544_vm2, %v1615_v38, %v1617_v33 }
 0x42a   :  { %1763 = vmatpush.bf16.msra.mxu0 %v1669_v62 }
 0x42c   :  { %v1607_v19 = vpop.permute.xlu1 %1606 }
 0x42d   :  { %1898 = vmatmul.msk.bf16.vlgmr.msra.gmra.mxu0 %vm1047_vm14, %v1168_v24  ;;  %v1666_v30 = vsel %vm544_vm2, %v1607_v19, %v2995_v32  ;;  %v1789_v54 = vpop.permute.xlu0 %1788 }
 0x42e   :  { %1724 = vmatpush.bf16.msrb.mxu1 %v1666_v30 }
 0x431   :  { %1895 = vmatmul.msk.bf16.vlgmr.msrb.gmra.mxu1 %vm1047_vm14, %v1168_v24 }
 0x47b   :  { %v1739_v40 = vpop.f32.mrf.mxu2 }
 0x47c   :  { %v1776_v15 = vadd.f32 %v1773_v60, %v1739_v40 }
 0x47e   :  { %v1778_v51 = vmax.f32 %v1776_v15, 0.0 }
 0x480   :  { %v1781_v56 = vrot.slane %v1778_v51, 4 }
 0x483   :  { %v1741_v28 = vpop.f32.mrf.mxu2 }
 0x4a5   :  { %v1752_v0 = vpop.f32.mrf.mxu3 }
 0x4a6   :  { %v1791_v9 = vadd.f32 %v1789_v54, %v1752_v0 }
 0x4a8   :  { %v1793_v21 = vmax.f32 %v1791_v9, 0.0 }
 0x4aa   :  { %v1765_v45 = vpop.f32.mrf.mxu0 }
 0x4ab   :  { %v1792_v25 = vadd.f32 %v1789_v54, %v1765_v45 }
 0x4ad   :  { %v1794_v27 = vmax.f32 %v1792_v25, 0.0  ;;  %v1754_v58 = vpop.f32.mrf.mxu3 }
 0x4ae   :  { %v1726_v22 = vpop.f32.mrf.mxu1 }
 0x4af   :  { %v1797_v6 = vrot.slane %v1794_v27, 4  ;;  %v1775_v20 = vadd.f32 %v1773_v60, %v1726_v22 }
 0x4b1   :  { %v1798_v41 = vsel %vm838_vm10, %v1793_v21, %v1797_v6  ;;  %v1777_v39 = vmax.f32 %v1775_v20, 0.0 }
 0x4b2   :  { %1801 = vst [vmem:[#allocation10 + $0x8] sm:$0xff] %v1798_v41  ;;  %v1767_v52 = vpop.f32.mrf.mxu0 }
 0x4b3   :  { %v1782_v32 = vsel %vm838_vm10, %v1777_v39, %v1781_v56 }
 0x4b4   :  { %1784 = vst [vmem:[#allocation10] sm:$0xff] %v1782_v32 }
 0x4b5   :  { %1814 = dma.vmem_to_hbm [thread:$0]  %s1807_s26, 256, %s1809_s29, [#allocation6], %s2109_s23, %s2109_s23, %s2110_s0  }
 0x4b6   :  { %v1728_v57 = vpop.f32.mrf.mxu1 }
 0x4b7   :  { %2100 = dma.done.wait [#allocation6], 256  }
 0x4b8   :  { %2101 = vsyncadd [#allocation6], 4294967040 }
 0x4b9   :  { %1819 = vsyncpa [#allocation5], 1 }
 0x4ba   :  { %1820 = vsyncpa [#allocation8], 1 }
 0x4bb   :  { %1821 = vsyncpa [#allocation6], 1 }

</bundles_post_ra>
